<compile_context>
chip_gen: v7x
topology: tpu7x:2x2x1
jax: 0.10.0
libtpu: 0.0.40
codegen_flags: <defaults>
</compile_context>

<pallas_src>
import math
from functools import partial

import jax
import jax.numpy as jnp
from jax.experimental import pallas as pl
from jax.experimental.pallas import tpu as pltpu

_INV_SQRT2 = 1.0 / math.sqrt(2.0)


# ----------------------------- in-kernel helpers -----------------------------
def _erf(x):
    # Abramowitz & Stegun 7.1.26 (|err| < 1.5e-7): keeps torch.nn.GELU()'s
    # erf semantics using exp (EUP) + approx reciprocal (EUP) + VPU ops only.
    a1, a2, a3, a4, a5 = (0.254829592, -0.284496736, 1.421413741,
                          -1.453152027, 1.061405429)
    p = 0.3275911
    sgn = jnp.where(x < 0.0, -1.0, 1.0)
    ax = jnp.abs(x)
    t = pl.reciprocal(1.0 + p * ax, approx=True)          # EUP vrcp, off the VALU
    poly = ((((a5 * t + a4) * t + a3) * t + a2) * t + a1) * t
    return sgn * (1.0 - poly * jnp.exp(-ax * ax))


def _gelu(x):
    # erf-based GELU, matching torch.nn.GELU() default
    return 0.5 * x * (1.0 + _erf(x * _INV_SQRT2))


def _groupnorm1(acc, gamma, beta, eps):
    # GroupNorm(num_groups=1): stats over all C*HW elements of one sample,
    # single pass (sum + sum of squares), biased variance like torch.
    n = float(acc.shape[0] * acc.shape[1])
    s = jnp.sum(acc, keepdims=True)                        # (1, 1)
    ss = jnp.sum(acc * acc, keepdims=True)                 # (1, 1)
    mean = s / n
    var = jnp.maximum(ss / n - mean * mean, 0.0)
    # gamma/beta are (C, 1): lane-broadcast is cheap in the (C, HW) layout.
    return (acc - mean) * jax.lax.rsqrt(var + eps) * gamma + beta


# --------------------------------- kernel ------------------------------------
def _double_conv_kernel(x_ref, w1_ref, g1_ref, b1_ref, w2_ref, g2_ref, b2_ref,
                        out_ref, pad_ref, tap_ref,
                        *, residual, eps, width, lpad):
    bt, cin, hw = x_ref.shape
    cmid = w1_ref.shape[0]

    # Zero the shared halo slab unconditionally every grid step (no
    # program_id==0 gating -> correct under "parallel"/megacore sharding).
    # Only the <=17-lane halo around the interior must stay zero; zeroing the
    # whole slab is a handful of vregs of lane-dense stores.
    pad_ref[...] = jnp.zeros_like(pad_ref)

    # Column-edge masks: taps with dw=+/-1 must not read across a row boundary
    # of the flattened HW axis (dh=+/-1 row crossings land in the zero halo).
    col = jax.lax.broadcasted_iota(jnp.int32, (1, hw), 1) % width
    not_left = (col >= 1).astype(jnp.float32)              # valid when dw == -1
    not_right = (col <= width - 2).astype(jnp.float32)     # valid when dw == +1

    def conv3x3(x_mat, w_ref, c):
        # Lane-aligned, lane-dense interior write of the (C, HW) slab.
        pad_ref[0:c, lpad:lpad + hw] = x_mat
        # Assemble the merged-K im2col operand (9C, HW) from 9 statically
        # offset lane slices; every store is lane-dense (HW minor).
        for kh in range(3):
            for kw in range(3):
                off = (kh - 1) * width + (kw - 1)
                t = pad_ref[0:c, lpad + off:lpad + off + hw]
                if kw == 0:
                    t = t * not_left
                elif kw == 2:
                    t = t * not_right
                k = kh * 3 + kw
                tap_ref[k * c:(k + 1) * c, :] = t
        # One MXU matmul per stage: (Cout, 9C) x (9C, HW) -> (Cout, HW),
        # already NCHW-flat -> no output transpose needed.
        return jnp.dot(w_ref[...], tap_ref[0:9 * c, :],
                       preferred_element_type=jnp.float32)

    for s in range(bt):                                    # bt is static
        x_mat = x_ref[s]                                   # (Cin, HW) f32
        # stage 1: conv3x3 -> GroupNorm(1) -> GELU (stays in VMEM/vregs)
        h1 = _gelu(_groupnorm1(conv3x3(x_mat, w1_ref, cin),
                               g1_ref[...], b1_ref[...], eps))
        # stage 2: conv3x3 -> GroupNorm(1) [-> +x -> GELU]
        y = _groupnorm1(conv3x3(h1, w2_ref, cmid),
                        g2_ref[...], b2_ref[...], eps)
        if residual:
            y = _gelu(x_mat + y)                           # exact f32 residual
        out_ref[s] = y.astype(out_ref.dtype)               # lane-dense writeback


# ------------------------------ JAX wrapper -----------------------------------
def _pick_batch_block(b):
    # Amortize the ~0.35 us per-grid-step overhead over several samples while
    # keeping at least 2 grid steps so both v7x TensorCores get work.
    if b < 4:
        return 1
    bt = min(8, b // 2)
    while b % bt:
        bt -= 1
    return max(bt, 1)


def double_conv_forward(x_nchw, params, *, residual, batch_block=None):
    """Fused Pallas implementation of DoubleConv.forward. I/O are NCHW f32."""
    w1, g1, b1 = params["w1"], params["g1"], params["b1"]
    w2, g2, b2 = params["w2"], params["g2"], params["b2"]
    b, cin, h, w = x_nchw.shape
    cmid, cout = w1.shape[0], w2.shape[0]
    if residual and cin != cout:
        raise ValueError("residual DoubleConv requires in_channels == out_channels")
    hw = h * w
    bt = batch_block or _pick_batch_block(b)
    assert b % bt == 0

    # Channels-major: NCHW is already (B, C, H*W) after a free reshape.
    x_flat = x_nchw.reshape(b, cin, hw).astype(jnp.float32)

    # OIHW -> (Cout, 9*Cin) with the contraction ordered (kh, kw, cin), which
    # matches the in-kernel tap-slab layout.
    w1_mat = jnp.transpose(w1, (0, 2, 3, 1)).reshape(cmid, 9 * cin).astype(jnp.float32)
    w2_mat = jnp.transpose(w2, (0, 2, 3, 1)).reshape(cout, 9 * cmid).astype(jnp.float32)
    g1c = g1.reshape(cmid, 1).astype(jnp.float32)
    b1c = b1.reshape(cmid, 1).astype(jnp.float32)
    g2c = g2.reshape(cout, 1).astype(jnp.float32)
    b2c = b2.reshape(cout, 1).astype(jnp.float32)

    # Halo of the 1-D padded slab: >= w+1 lanes, rounded up to 128 so the
    # interior write stays lane-aligned.
    lpad = pl.cdiv(w + 1, 128) * 128
    cmax = max(cin, cmid)

    kernel = partial(_double_conv_kernel, residual=residual, eps=1e-5,
                     width=w, lpad=lpad)

    flops = 2 * b * hw * 9 * (cin * cmid + cmid * cout)
    transcendentals = 2 * b * hw * (cmid + (cout if residual else 0))
    bytes_accessed = (x_flat.size * 4 + (w1_mat.size + w2_mat.size) * 4
                      + 2 * (cmid + cout) * 4 + b * cout * hw * 4)

    out_flat = pl.pallas_call(
        kernel,
        out_shape=jax.ShapeDtypeStruct((b, cout, hw), jnp.float32),
        grid=(b // bt,),
        in_specs=[
            pl.BlockSpec((bt, cin, hw), lambda i: (i, 0, 0)),
            pl.BlockSpec((cmid, 9 * cin), lambda i: (0, 0)),
            pl.BlockSpec((cmid, 1), lambda i: (0, 0)),
            pl.BlockSpec((cmid, 1), lambda i: (0, 0)),
            pl.BlockSpec((cout, 9 * cmid), lambda i: (0, 0)),
            pl.BlockSpec((cout, 1), lambda i: (0, 0)),
            pl.BlockSpec((cout, 1), lambda i: (0, 0)),
        ],
        out_specs=pl.BlockSpec((bt, cout, hw), lambda i: (i, 0, 0)),
        scratch_shapes=[
            pltpu.VMEM((cmax, lpad + hw + lpad), jnp.float32),   # shared halo slab
            pltpu.VMEM((9 * cmax, hw), jnp.float32),             # shared im2col slab
        ],
        compiler_params=pltpu.CompilerParams(
            dimension_semantics=("parallel",),                   # batch -> megacore
            vmem_limit_bytes=32 * 1024 * 1024,
        ),
        cost_estimate=pl.CostEstimate(
            flops=flops, transcendentals=transcendentals,
            bytes_accessed=bytes_accessed),
    )(x_flat, w1_mat, g1c, b1c, w2_mat, g2c, b2c)

    # Kernel emits NCHW-flat (B, Cout, H*W); reshape to NCHW is free.
    return out_flat.reshape(b, cout, h, w)


# ------------------------------ params / reference ----------------------------
def init_params(key, in_channels, out_channels, mid_channels=None):
    if mid_channels is None:
        mid_channels = out_channels
    k1, k2, k3, k4, k5, k6 = jax.random.split(key, 6)
    std1 = math.sqrt(2.0 / (in_channels * 9))
    std2 = math.sqrt(2.0 / (mid_channels * 9))
    return dict(
        w1=std1 * jax.random.normal(k1, (mid_channels, in_channels, 3, 3), jnp.float32),
        g1=1.0 + 0.1 * jax.random.normal(k2, (mid_channels,), jnp.float32),
        b1=0.1 * jax.random.normal(k3, (mid_channels,), jnp.float32),
        w2=std2 * jax.random.normal(k4, (out_channels, mid_channels, 3, 3), jnp.float32),
        g2=1.0 + 0.1 * jax.random.normal(k5, (out_channels,), jnp.float32),
        b2=0.1 * jax.random.normal(k6, (out_channels,), jnp.float32),
    )


def _ref_groupnorm1(x, gamma, beta, eps=1e-5):
    b = x.shape[0]
    flat = x.reshape(b, -1)
    mean = jnp.mean(flat, axis=1).reshape(b, 1, 1, 1)
    var = jnp.var(flat, axis=1).reshape(b, 1, 1, 1)
    xn = (x - mean) * jax.lax.rsqrt(var + eps)
    return xn * gamma.reshape(1, -1, 1, 1) + beta.reshape(1, -1, 1, 1)


def _ref_gelu(x):
    return 0.5 * x * (1.0 + jax.scipy.special.erf(x * _INV_SQRT2))


def ref_forward(x, params, residual):
    conv = lambda inp, w: jax.lax.conv_general_dilated(
        inp, w, window_strides=(1, 1), padding=((1, 1), (1, 1)),
        dimension_numbers=("NCHW", "OIHW", "NCHW"))
    h = conv(x, params["w1"])
    h = _ref_gelu(_ref_groupnorm1(h, params["g1"], params["b1"]))
    h = conv(h, params["w2"])
    h = _ref_groupnorm1(h, params["g2"], params["b2"])
    return _ref_gelu(x + h) if residual else h


# ----------------------------------- main -------------------------------------
if __name__ == "__main__":
    key = jax.random.PRNGKey(0)
    kx, kp1, kp2 = jax.random.split(key, 3)

    x = jax.random.normal(kx, (2, 4, 16, 16), jnp.float32)  # NCHW

    # Only approximation left is the in-kernel erf polynomial / approx recip.
    TOL = dict(atol=2e-2, rtol=2e-2)

    # Case 1: DoubleConv(4, 8), residual=False (mid_channels defaults to 8)
    params_a = init_params(kp1, in_channels=4, out_channels=8)
    out_a = double_conv_forward(x, params_a, residual=False)
    jax.block_until_ready(out_a)
    ref_a = ref_forward(x, params_a, residual=False)
    assert out_a.shape == (2, 8, 16, 16)
    assert jnp.allclose(out_a, ref_a, **TOL), "non-residual mismatch"

    # Case 2: DoubleConv(4, 4, residual=True)
    params_b = init_params(kp2, in_channels=4, out_channels=4)
    out_b = double_conv_forward(x, params_b, residual=True)
    jax.block_until_ready(out_b)
    ref_b = ref_forward(x, params_b, residual=True)
    assert out_b.shape == (2, 4, 16, 16)
    assert jnp.allclose(out_b, ref_b, **TOL), "residual mismatch"

    print("KERNEL_OK")
</pallas_src>

<mosaic_0001>
module attributes {stable_mosaic.version = 11 : i64} {
  func.func @_double_conv_kernel(%arg0: i32, %arg1: memref<1x4x256xf32, #tpu.memory_space<vmem>>, %arg2: memref<8x36xf32, #tpu.memory_space<vmem>>, %arg3: memref<8x1xf32, #tpu.memory_space<vmem>>, %arg4: memref<8x1xf32, #tpu.memory_space<vmem>>, %arg5: memref<8x72xf32, #tpu.memory_space<vmem>>, %arg6: memref<8x1xf32, #tpu.memory_space<vmem>>, %arg7: memref<8x1xf32, #tpu.memory_space<vmem>>, %arg8: memref<1x8x256xf32, #tpu.memory_space<vmem>>, %arg9: memref<8x512xf32, #tpu.memory_space<vmem>>, %arg10: memref<72x256xf32, #tpu.memory_space<vmem>>) attributes {dimension_semantics = [#tpu.dimension_semantics<parallel>], iteration_bounds = array<i64: 2>, scalar_prefetch = 0 : i64, scratch_operands = 2 : i64, tpu.core_type = #tpu.core_type<tc>, window_params = [{transform_indices = @transform_0, window_bounds = array<i64: 1, 4, 256>}, {pipeline_mode = #tpu.pipeline_mode<synchronous>, transform_indices = @transform_1, window_bounds = array<i64: 8, 36>}, {pipeline_mode = #tpu.pipeline_mode<synchronous>, transform_indices = @transform_2, window_bounds = array<i64: 8, 1>}, {pipeline_mode = #tpu.pipeline_mode<synchronous>, transform_indices = @transform_3, window_bounds = array<i64: 8, 1>}, {pipeline_mode = #tpu.pipeline_mode<synchronous>, transform_indices = @transform_4, window_bounds = array<i64: 8, 72>}, {pipeline_mode = #tpu.pipeline_mode<synchronous>, transform_indices = @transform_5, window_bounds = array<i64: 8, 1>}, {pipeline_mode = #tpu.pipeline_mode<synchronous>, transform_indices = @transform_6, window_bounds = array<i64: 8, 1>}, {transform_indices = @transform_7, window_bounds = array<i64: 1, 8, 256>}]} {
    %cst = arith.constant 0.000000e+00 : f32
    %0 = vector.broadcast %cst : f32 to vector<8x512xf32>
    %c0 = arith.constant 0 : index
    %c0_0 = arith.constant 0 : index
    %1 = vector.load %arg9[%c0, %c0_0] : memref<8x512xf32, #tpu.memory_space<vmem>>, vector<8x512xf32>
    tpu.vector_store %arg9[%c0, %c0_0], %0 {strides = array<i32>} : memref<8x512xf32, #tpu.memory_space<vmem>>, vector<8x512xf32>,
    %2 = tpu.iota {dimensions = array<i32: 1>} : vector<1x256xi32>
    %c16_i32 = arith.constant 16 : i32
    %c0_i32 = arith.constant 0 : i32
    %3 = arith.cmpi eq, %c16_i32, %c0_i32 : i32
    %c1_i32 = arith.constant 1 : i32
    %4 = arith.select %3, %c1_i32, %c16_i32 : i32
    %5 = vector.broadcast %4 : i32 to vector<1x256xi32>
    %6 = arith.remsi %2, %5 : vector<1x256xi32>
    %c0_i32_1 = arith.constant 0 : i32
    %7 = vector.broadcast %c0_i32_1 : i32 to vector<1x256xi32>
    %8 = arith.cmpi ne, %6, %7 : vector<1x256xi32>
    %c0_i32_2 = arith.constant 0 : i32
    %9 = vector.broadcast %c0_i32_2 : i32 to vector<1x256xi32>
    %10 = arith.cmpi slt, %6, %9 : vector<1x256xi32>
    %c0_i32_3 = arith.constant 0 : i32
    %11 = arith.cmpi slt, %4, %c0_i32_3 : i32
    %12 = vector.broadcast %11 : i1 to vector<1x256xi1>
    %13 = vector.broadcast %12 : vector<1x256xi1> to vector<1x256xi1>
    %14 = arith.xori %10, %13 : vector<1x256xi1>
    %15 = arith.andi %14, %8 : vector<1x256xi1>
    %16 = vector.broadcast %4 : i32 to vector<1x256xi32>
    %17 = arith.addi %6, %16 : vector<1x256xi32>
    %18 = arith.select %15, %17, %6 : vector<1x256xi1>, vector<1x256xi32>
    %c1_i32_4 = arith.constant 1 : i32
    %19 = vector.broadcast %c1_i32_4 : i32 to vector<1x256xi32>
    %20 = arith.cmpi sge, %18, %19 : vector<1x256xi32>
    %21 = arith.extui %20 : vector<1x256xi1> to vector<1x256xi32>
    %22 = arith.sitofp %21 : vector<1x256xi32> to vector<1x256xf32>
    %c14_i32 = arith.constant 14 : i32
    %23 = vector.broadcast %c14_i32 : i32 to vector<1x256xi32>
    %24 = arith.cmpi sle, %18, %23 : vector<1x256xi32>
    %25 = arith.extui %24 : vector<1x256xi1> to vector<1x256xi32>
    %26 = arith.sitofp %25 : vector<1x256xi32> to vector<1x256xf32>
    %c0_5 = arith.constant 0 : index
    %c0_6 = arith.constant 0 : index
    %c0_7 = arith.constant 0 : index
    %27 = vector.load %arg1[%c0_5, %c0_6, %c0_7] : memref<1x4x256xf32, #tpu.memory_space<vmem>>, vector<1x4x256xf32>
    %28 = vector.shape_cast %27 : vector<1x4x256xf32> to vector<4x256xf32>
    %c0_8 = arith.constant 0 : index
    %c128 = arith.constant 128 : index
    %29 = vector.load %arg9[%c0_8, %c128] : memref<8x512xf32, #tpu.memory_space<vmem>>, vector<4x256xf32>
    tpu.vector_store %arg9[%c0_8, %c128], %28 {strides = array<i32>} : memref<8x512xf32, #tpu.memory_space<vmem>>, vector<4x256xf32>,
    %c0_9 = arith.constant 0 : index
    %c111 = arith.constant 111 : index
    %30 = vector.load %arg9[%c0_9, %c111] : memref<8x512xf32, #tpu.memory_space<vmem>>, vector<4x256xf32>
    %31 = vector.broadcast %22 : vector<1x256xf32> to vector<4x256xf32>
    %32 = arith.mulf %30, %31 : vector<4x256xf32>
    %c0_10 = arith.constant 0 : index
    %c0_11 = arith.constant 0 : index
    %33 = vector.load %arg10[%c0_10, %c0_11] : memref<72x256xf32, #tpu.memory_space<vmem>>, vector<4x256xf32>
    tpu.vector_store %arg10[%c0_10, %c0_11], %32 {strides = array<i32>} : memref<72x256xf32, #tpu.memory_space<vmem>>, vector<4x256xf32>,
    %c0_12 = arith.constant 0 : index
    %c112 = arith.constant 112 : index
    %34 = vector.load %arg9[%c0_12, %c112] : memref<8x512xf32, #tpu.memory_space<vmem>>, vector<4x256xf32>
    %c4 = arith.constant 4 : index
    %c0_13 = arith.constant 0 : index
    %35 = vector.load %arg10[%c4, %c0_13] : memref<72x256xf32, #tpu.memory_space<vmem>>, vector<4x256xf32>
    tpu.vector_store %arg10[%c4, %c0_13], %34 {strides = array<i32>} : memref<72x256xf32, #tpu.memory_space<vmem>>, vector<4x256xf32>,
    %c0_14 = arith.constant 0 : index
    %c113 = arith.constant 113 : index
    %36 = vector.load %arg9[%c0_14, %c113] : memref<8x512xf32, #tpu.memory_space<vmem>>, vector<4x256xf32>
    %37 = vector.broadcast %26 : vector<1x256xf32> to vector<4x256xf32>
    %38 = arith.mulf %36, %37 : vector<4x256xf32>
    %c8 = arith.constant 8 : index
    %c0_15 = arith.constant 0 : index
    %39 = vector.load %arg10[%c8, %c0_15] : memref<72x256xf32, #tpu.memory_space<vmem>>, vector<4x256xf32>
    tpu.vector_store %arg10[%c8, %c0_15], %38 {strides = array<i32>} : memref<72x256xf32, #tpu.memory_space<vmem>>, vector<4x256xf32>,
    %c0_16 = arith.constant 0 : index
    %c127 = arith.constant 127 : index
    %40 = vector.load %arg9[%c0_16, %c127] : memref<8x512xf32, #tpu.memory_space<vmem>>, vector<4x256xf32>
    %41 = vector.broadcast %22 : vector<1x256xf32> to vector<4x256xf32>
    %42 = arith.mulf %40, %41 : vector<4x256xf32>
    %c12 = arith.constant 12 : index
    %c0_17 = arith.constant 0 : index
    %43 = vector.load %arg10[%c12, %c0_17] : memref<72x256xf32, #tpu.memory_space<vmem>>, vector<4x256xf32>
    tpu.vector_store %arg10[%c12, %c0_17], %42 {strides = array<i32>} : memref<72x256xf32, #tpu.memory_space<vmem>>, vector<4x256xf32>,
    %c0_18 = arith.constant 0 : index
    %c128_19 = arith.constant 128 : index
    %44 = vector.load %arg9[%c0_18, %c128_19] : memref<8x512xf32, #tpu.memory_space<vmem>>, vector<4x256xf32>
    %c16 = arith.constant 16 : index
    %c0_20 = arith.constant 0 : index
    %45 = vector.load %arg10[%c16, %c0_20] : memref<72x256xf32, #tpu.memory_space<vmem>>, vector<4x256xf32>
    tpu.vector_store %arg10[%c16, %c0_20], %44 {strides = array<i32>} : memref<72x256xf32, #tpu.memory_space<vmem>>, vector<4x256xf32>,
    %c0_21 = arith.constant 0 : index
    %c129 = arith.constant 129 : index
    %46 = vector.load %arg9[%c0_21, %c129] : memref<8x512xf32, #tpu.memory_space<vmem>>, vector<4x256xf32>
    %47 = vector.broadcast %26 : vector<1x256xf32> to vector<4x256xf32>
    %48 = arith.mulf %46, %47 : vector<4x256xf32>
    %c20 = arith.constant 20 : index
    %c0_22 = arith.constant 0 : index
    %49 = vector.load %arg10[%c20, %c0_22] : memref<72x256xf32, #tpu.memory_space<vmem>>, vector<4x256xf32>
    tpu.vector_store %arg10[%c20, %c0_22], %48 {strides = array<i32>} : memref<72x256xf32, #tpu.memory_space<vmem>>, vector<4x256xf32>,
    %c0_23 = arith.constant 0 : index
    %c143 = arith.constant 143 : index
    %50 = vector.load %arg9[%c0_23, %c143] : memref<8x512xf32, #tpu.memory_space<vmem>>, vector<4x256xf32>
    %51 = vector.broadcast %22 : vector<1x256xf32> to vector<4x256xf32>
    %52 = arith.mulf %50, %51 : vector<4x256xf32>
    %c24 = arith.constant 24 : index
    %c0_24 = arith.constant 0 : index
    %53 = vector.load %arg10[%c24, %c0_24] : memref<72x256xf32, #tpu.memory_space<vmem>>, vector<4x256xf32>
    tpu.vector_store %arg10[%c24, %c0_24], %52 {strides = array<i32>} : memref<72x256xf32, #tpu.memory_space<vmem>>, vector<4x256xf32>,
    %c0_25 = arith.constant 0 : index
    %c144 = arith.constant 144 : index
    %54 = vector.load %arg9[%c0_25, %c144] : memref<8x512xf32, #tpu.memory_space<vmem>>, vector<4x256xf32>
    %c28 = arith.constant 28 : index
    %c0_26 = arith.constant 0 : index
    %55 = vector.load %arg10[%c28, %c0_26] : memref<72x256xf32, #tpu.memory_space<vmem>>, vector<4x256xf32>
    tpu.vector_store %arg10[%c28, %c0_26], %54 {strides = array<i32>} : memref<72x256xf32, #tpu.memory_space<vmem>>, vector<4x256xf32>,
    %c0_27 = arith.constant 0 : index
    %c145 = arith.constant 145 : index
    %56 = vector.load %arg9[%c0_27, %c145] : memref<8x512xf32, #tpu.memory_space<vmem>>, vector<4x256xf32>
    %57 = vector.broadcast %26 : vector<1x256xf32> to vector<4x256xf32>
    %58 = arith.mulf %56, %57 : vector<4x256xf32>
    %c32 = arith.constant 32 : index
    %c0_28 = arith.constant 0 : index
    %59 = vector.load %arg10[%c32, %c0_28] : memref<72x256xf32, #tpu.memory_space<vmem>>, vector<4x256xf32>
    tpu.vector_store %arg10[%c32, %c0_28], %58 {strides = array<i32>} : memref<72x256xf32, #tpu.memory_space<vmem>>, vector<4x256xf32>,
    %c0_29 = arith.constant 0 : index
    %c0_30 = arith.constant 0 : index
    %60 = vector.load %arg2[%c0_29, %c0_30] : memref<8x36xf32, #tpu.memory_space<vmem>>, vector<8x36xf32>
    %c0_31 = arith.constant 0 : index
    %c0_32 = arith.constant 0 : index
    %61 = vector.load %arg10[%c0_31, %c0_32] : memref<72x256xf32, #tpu.memory_space<vmem>>, vector<36x256xf32>
    %cst_33 = arith.constant dense<0.000000e+00> : vector<8x256xf32>
    %62 = tpu.matmul %60, %61, %cst_33 {dimension_numbers = #tpu.dot_dimension_numbers<[1], [0], [0], [1], [0, 0, 1, 1], [], []>} : vector<8x36xf32>, vector<36x256xf32>, vector<8x256xf32> -> vector<8x256xf32>
    %c0_34 = arith.constant 0 : index
    %c0_35 = arith.constant 0 : index
    %63 = vector.load %arg3[%c0_34, %c0_35] : memref<8x1xf32, #tpu.memory_space<vmem>>, vector<8x1xf32>
    %c0_36 = arith.constant 0 : index
    %c0_37 = arith.constant 0 : index
    %64 = vector.load %arg4[%c0_36, %c0_37] : memref<8x1xf32, #tpu.memory_space<vmem>>, vector<8x1xf32>
    %65 = vector.shape_cast %62 : vector<8x256xf32> to vector<1x8x256xf32>
    %cst_38 = arith.constant dense<0.000000e+00> : vector<1xf32>
    %66 = vector.multi_reduction <add>, %65, %cst_38 [1, 2] : vector<1x8x256xf32> to vector<1xf32>
    %67 = vector.shape_cast %66 : vector<1xf32> to vector<1x1x1xf32>
    %68 = vector.extract %67[0, 0, 0] : f32 from vector<1x1x1xf32>
    %69 = vector.broadcast %68 : f32 to vector<1x1xf32>
    %70 = arith.mulf %62, %62 : vector<8x256xf32>
    %71 = vector.shape_cast %70 : vector<8x256xf32> to vector<1x8x256xf32>
    %cst_39 = arith.constant dense<0.000000e+00> : vector<1xf32>
    %72 = vector.multi_reduction <add>, %71, %cst_39 [1, 2] : vector<1x8x256xf32> to vector<1xf32>
    %73 = vector.shape_cast %72 : vector<1xf32> to vector<1x1x1xf32>
    %74 = vector.extract %73[0, 0, 0] : f32 from vector<1x1x1xf32>
    %75 = vector.broadcast %74 : f32 to vector<1x1xf32>
    %cst_40 = arith.constant 2.048000e+03 : f32
    %76 = vector.broadcast %cst_40 : f32 to vector<1x1xf32>
    %77 = arith.divf %69, %76 : vector<1x1xf32>
    %cst_41 = arith.constant 2.048000e+03 : f32
    %78 = vector.broadcast %cst_41 : f32 to vector<1x1xf32>
    %79 = arith.divf %75, %78 : vector<1x1xf32>
    %80 = arith.mulf %77, %77 : vector<1x1xf32>
    %81 = arith.subf %79, %80 : vector<1x1xf32>
    %cst_42 = arith.constant 0.000000e+00 : f32
    %82 = vector.broadcast %cst_42 : f32 to vector<1x1xf32>
    %83 = arith.maximumf %81, %82 : vector<1x1xf32>
    %84 = vector.broadcast %77 : vector<1x1xf32> to vector<8x256xf32>
    %85 = arith.subf %62, %84 : vector<8x256xf32>
    %cst_43 = arith.constant 9.99999974E-6 : f32
    %86 = vector.broadcast %cst_43 : f32 to vector<1x1xf32>
    %87 = arith.addf %83, %86 : vector<1x1xf32>
    %88 = math.rsqrt %87 : vector<1x1xf32>
    %89 = vector.broadcast %88 : vector<1x1xf32> to vector<8x256xf32>
    %90 = arith.mulf %85, %89 : vector<8x256xf32>
    %91 = vector.broadcast %63 : vector<8x1xf32> to vector<8x256xf32>
    %92 = arith.mulf %90, %91 : vector<8x256xf32>
    %93 = vector.broadcast %64 : vector<8x1xf32> to vector<8x256xf32>
    %94 = arith.addf %92, %93 : vector<8x256xf32>
    %cst_44 = arith.constant 5.000000e-01 : f32
    %95 = vector.broadcast %cst_44 : f32 to vector<8x256xf32>
    %96 = arith.mulf %95, %94 : vector<8x256xf32>
    %cst_45 = arith.constant 0.707106769 : f32
    %97 = vector.broadcast %cst_45 : f32 to vector<8x256xf32>
    %98 = arith.mulf %94, %97 : vector<8x256xf32>
    %cst_46 = arith.constant 0.000000e+00 : f32
    %99 = vector.broadcast %cst_46 : f32 to vector<8x256xf32>
    %100 = arith.cmpf olt, %98, %99 : vector<8x256xf32>
    %cst_47 = arith.constant -1.000000e+00 : f32
    %cst_48 = arith.constant 1.000000e+00 : f32
    %101 = vector.broadcast %cst_47 : f32 to vector<8x256xf32>
    %102 = vector.broadcast %cst_48 : f32 to vector<8x256xf32>
    %103 = arith.select %100, %101, %102 : vector<8x256xi1>, vector<8x256xf32>
    %104 = math.absf %98 : vector<8x256xf32>
    %cst_49 = arith.constant 0.327591091 : f32
    %105 = vector.broadcast %cst_49 : f32 to vector<8x256xf32>
    %106 = arith.mulf %105, %104 : vector<8x256xf32>
    %cst_50 = arith.constant 1.000000e+00 : f32
    %107 = vector.broadcast %cst_50 : f32 to vector<8x256xf32>
    %108 = arith.addf %107, %106 : vector<8x256xf32>
    %109 = tpu.reciprocal %108 {approx = true} : vector<8x256xf32> -> vector<8x256xf32>
    %cst_51 = arith.constant 1.06140542 : f32
    %110 = vector.broadcast %cst_51 : f32 to vector<8x256xf32>
    %111 = arith.mulf %110, %109 : vector<8x256xf32>
    %cst_52 = arith.constant -1.45315206 : f32
    %112 = vector.broadcast %cst_52 : f32 to vector<8x256xf32>
    %113 = arith.addf %111, %112 : vector<8x256xf32>
    %114 = arith.mulf %113, %109 : vector<8x256xf32>
    %cst_53 = arith.constant 1.42141378 : f32
    %115 = vector.broadcast %cst_53 : f32 to vector<8x256xf32>
    %116 = arith.addf %114, %115 : vector<8x256xf32>
    %117 = arith.mulf %116, %109 : vector<8x256xf32>
    %cst_54 = arith.constant -0.284496725 : f32
    %118 = vector.broadcast %cst_54 : f32 to vector<8x256xf32>
    %119 = arith.addf %117, %118 : vector<8x256xf32>
    %120 = arith.mulf %119, %109 : vector<8x256xf32>
    %cst_55 = arith.constant 0.254829586 : f32
    %121 = vector.broadcast %cst_55 : f32 to vector<8x256xf32>
    %122 = arith.addf %120, %121 : vector<8x256xf32>
    %123 = arith.mulf %122, %109 : vector<8x256xf32>
    %cst_56 = arith.constant 0.000000e+00 : f32
    %124 = vector.broadcast %cst_56 : f32 to vector<8x256xf32>
    %125 = arith.subf %124, %104 : vector<8x256xf32>
    %126 = arith.mulf %125, %104 : vector<8x256xf32>
    %127 = math.exp %126 : vector<8x256xf32>
    %128 = arith.mulf %123, %127 : vector<8x256xf32>
    %cst_57 = arith.constant 1.000000e+00 : f32
    %129 = vector.broadcast %cst_57 : f32 to vector<8x256xf32>
    %130 = arith.subf %129, %128 : vector<8x256xf32>
    %131 = arith.mulf %103, %130 : vector<8x256xf32>
    %cst_58 = arith.constant 1.000000e+00 : f32
    %132 = vector.broadcast %cst_58 : f32 to vector<8x256xf32>
    %133 = arith.addf %132, %131 : vector<8x256xf32>
    %134 = arith.mulf %96, %133 : vector<8x256xf32>
    %c0_59 = arith.constant 0 : index
    %c128_60 = arith.constant 128 : index
    %135 = vector.load %arg9[%c0_59, %c128_60] : memref<8x512xf32, #tpu.memory_space<vmem>>, vector<8x256xf32>
    tpu.vector_store %arg9[%c0_59, %c128_60], %134 {strides = array<i32>} : memref<8x512xf32, #tpu.memory_space<vmem>>, vector<8x256xf32>,
    %c0_61 = arith.constant 0 : index
    %c111_62 = arith.constant 111 : index
    %136 = vector.load %arg9[%c0_61, %c111_62] : memref<8x512xf32, #tpu.memory_space<vmem>>, vector<8x256xf32>
    %137 = vector.broadcast %22 : vector<1x256xf32> to vector<8x256xf32>
    %138 = arith.mulf %136, %137 : vector<8x256xf32>
    %c0_63 = arith.constant 0 : index
    %c0_64 = arith.constant 0 : index
    %139 = vector.load %arg10[%c0_63, %c0_64] : memref<72x256xf32, #tpu.memory_space<vmem>>, vector<8x256xf32>
    tpu.vector_store %arg10[%c0_63, %c0_64], %138 {strides = array<i32>} : memref<72x256xf32, #tpu.memory_space<vmem>>, vector<8x256xf32>,
    %c0_65 = arith.constant 0 : index
    %c112_66 = arith.constant 112 : index
    %140 = vector.load %arg9[%c0_65, %c112_66] : memref<8x512xf32, #tpu.memory_space<vmem>>, vector<8x256xf32>
    %c8_67 = arith.constant 8 : index
    %c0_68 = arith.constant 0 : index
    %141 = vector.load %arg10[%c8_67, %c0_68] : memref<72x256xf32, #tpu.memory_space<vmem>>, vector<8x256xf32>
    tpu.vector_store %arg10[%c8_67, %c0_68], %140 {strides = array<i32>} : memref<72x256xf32, #tpu.memory_space<vmem>>, vector<8x256xf32>,
    %c0_69 = arith.constant 0 : index
    %c113_70 = arith.constant 113 : index
    %142 = vector.load %arg9[%c0_69, %c113_70] : memref<8x512xf32, #tpu.memory_space<vmem>>, vector<8x256xf32>
    %143 = vector.broadcast %26 : vector<1x256xf32> to vector<8x256xf32>
    %144 = arith.mulf %142, %143 : vector<8x256xf32>
    %c16_71 = arith.constant 16 : index
    %c0_72 = arith.constant 0 : index
    %145 = vector.load %arg10[%c16_71, %c0_72] : memref<72x256xf32, #tpu.memory_space<vmem>>, vector<8x256xf32>
    tpu.vector_store %arg10[%c16_71, %c0_72], %144 {strides = array<i32>} : memref<72x256xf32, #tpu.memory_space<vmem>>, vector<8x256xf32>,
    %c0_73 = arith.constant 0 : index
    %c127_74 = arith.constant 127 : index
    %146 = vector.load %arg9[%c0_73, %c127_74] : memref<8x512xf32, #tpu.memory_space<vmem>>, vector<8x256xf32>
    %147 = vector.broadcast %22 : vector<1x256xf32> to vector<8x256xf32>
    %148 = arith.mulf %146, %147 : vector<8x256xf32>
    %c24_75 = arith.constant 24 : index
    %c0_76 = arith.constant 0 : index
    %149 = vector.load %arg10[%c24_75, %c0_76] : memref<72x256xf32, #tpu.memory_space<vmem>>, vector<8x256xf32>
    tpu.vector_store %arg10[%c24_75, %c0_76], %148 {strides = array<i32>} : memref<72x256xf32, #tpu.memory_space<vmem>>, vector<8x256xf32>,
    %c0_77 = arith.constant 0 : index
    %c128_78 = arith.constant 128 : index
    %150 = vector.load %arg9[%c0_77, %c128_78] : memref<8x512xf32, #tpu.memory_space<vmem>>, vector<8x256xf32>
    %c32_79 = arith.constant 32 : index
    %c0_80 = arith.constant 0 : index
    %151 = vector.load %arg10[%c32_79, %c0_80] : memref<72x256xf32, #tpu.memory_space<vmem>>, vector<8x256xf32>
    tpu.vector_store %arg10[%c32_79, %c0_80], %150 {strides = array<i32>} : memref<72x256xf32, #tpu.memory_space<vmem>>, vector<8x256xf32>,
    %c0_81 = arith.constant 0 : index
    %c129_82 = arith.constant 129 : index
    %152 = vector.load %arg9[%c0_81, %c129_82] : memref<8x512xf32, #tpu.memory_space<vmem>>, vector<8x256xf32>
    %153 = vector.broadcast %26 : vector<1x256xf32> to vector<8x256xf32>
    %154 = arith.mulf %152, %153 : vector<8x256xf32>
    %c40 = arith.constant 40 : index
    %c0_83 = arith.constant 0 : index
    %155 = vector.load %arg10[%c40, %c0_83] : memref<72x256xf32, #tpu.memory_space<vmem>>, vector<8x256xf32>
    tpu.vector_store %arg10[%c40, %c0_83], %154 {strides = array<i32>} : memref<72x256xf32, #tpu.memory_space<vmem>>, vector<8x256xf32>,
    %c0_84 = arith.constant 0 : index
    %c143_85 = arith.constant 143 : index
    %156 = vector.load %arg9[%c0_84, %c143_85] : memref<8x512xf32, #tpu.memory_space<vmem>>, vector<8x256xf32>
    %157 = vector.broadcast %22 : vector<1x256xf32> to vector<8x256xf32>
    %158 = arith.mulf %156, %157 : vector<8x256xf32>
    %c48 = arith.constant 48 : index
    %c0_86 = arith.constant 0 : index
    %159 = vector.load %arg10[%c48, %c0_86] : memref<72x256xf32, #tpu.memory_space<vmem>>, vector<8x256xf32>
    tpu.vector_store %arg10[%c48, %c0_86], %158 {strides = array<i32>} : memref<72x256xf32, #tpu.memory_space<vmem>>, vector<8x256xf32>,
    %c0_87 = arith.constant 0 : index
    %c144_88 = arith.constant 144 : index
    %160 = vector.load %arg9[%c0_87, %c144_88] : memref<8x512xf32, #tpu.memory_space<vmem>>, vector<8x256xf32>
    %c56 = arith.constant 56 : index
    %c0_89 = arith.constant 0 : index
    %161 = vector.load %arg10[%c56, %c0_89] : memref<72x256xf32, #tpu.memory_space<vmem>>, vector<8x256xf32>
    tpu.vector_store %arg10[%c56, %c0_89], %160 {strides = array<i32>} : memref<72x256xf32, #tpu.memory_space<vmem>>, vector<8x256xf32>,
    %c0_90 = arith.constant 0 : index
    %c145_91 = arith.constant 145 : index
    %162 = vector.load %arg9[%c0_90, %c145_91] : memref<8x512xf32, #tpu.memory_space<vmem>>, vector<8x256xf32>
    %163 = vector.broadcast %26 : vector<1x256xf32> to vector<8x256xf32>
    %164 = arith.mulf %162, %163 : vector<8x256xf32>
    %c64 = arith.constant 64 : index
    %c0_92 = arith.constant 0 : index
    %165 = vector.load %arg10[%c64, %c0_92] : memref<72x256xf32, #tpu.memory_space<vmem>>, vector<8x256xf32>
    tpu.vector_store %arg10[%c64, %c0_92], %164 {strides = array<i32>} : memref<72x256xf32, #tpu.memory_space<vmem>>, vector<8x256xf32>,
    %c0_93 = arith.constant 0 : index
    %c0_94 = arith.constant 0 : index
    %166 = vector.load %arg5[%c0_93, %c0_94] : memref<8x72xf32, #tpu.memory_space<vmem>>, vector<8x72xf32>
    %c0_95 = arith.constant 0 : index
    %c0_96 = arith.constant 0 : index
    %167 = vector.load %arg10[%c0_95, %c0_96] : memref<72x256xf32, #tpu.memory_space<vmem>>, vector<72x256xf32>
    %cst_97 = arith.constant dense<0.000000e+00> : vector<8x256xf32>
    %168 = tpu.matmul %166, %167, %cst_97 {dimension_numbers = #tpu.dot_dimension_numbers<[1], [0], [0], [1], [0, 0, 1, 1], [], []>} : vector<8x72xf32>, vector<72x256xf32>, vector<8x256xf32> -> vector<8x256xf32>
    %c0_98 = arith.constant 0 : index
    %c0_99 = arith.constant 0 : index
    %169 = vector.load %arg6[%c0_98, %c0_99] : memref<8x1xf32, #tpu.memory_space<vmem>>, vector<8x1xf32>
    %c0_100 = arith.constant 0 : index
    %c0_101 = arith.constant 0 : index
    %170 = vector.load %arg7[%c0_100, %c0_101] : memref<8x1xf32, #tpu.memory_space<vmem>>, vector<8x1xf32>
    %171 = vector.shape_cast %168 : vector<8x256xf32> to vector<1x8x256xf32>
    %cst_102 = arith.constant dense<0.000000e+00> : vector<1xf32>
    %172 = vector.multi_reduction <add>, %171, %cst_102 [1, 2] : vector<1x8x256xf32> to vector<1xf32>
    %173 = vector.shape_cast %172 : vector<1xf32> to vector<1x1x1xf32>
    %174 = vector.extract %173[0, 0, 0] : f32 from vector<1x1x1xf32>
    %175 = vector.broadcast %174 : f32 to vector<1x1xf32>
    %176 = arith.mulf %168, %168 : vector<8x256xf32>
    %177 = vector.shape_cast %176 : vector<8x256xf32> to vector<1x8x256xf32>
    %cst_103 = arith.constant dense<0.000000e+00> : vector<1xf32>
    %178 = vector.multi_reduction <add>, %177, %cst_103 [1, 2] : vector<1x8x256xf32> to vector<1xf32>
    %179 = vector.shape_cast %178 : vector<1xf32> to vector<1x1x1xf32>
    %180 = vector.extract %179[0, 0, 0] : f32 from vector<1x1x1xf32>
    %181 = vector.broadcast %180 : f32 to vector<1x1xf32>
    %cst_104 = arith.constant 2.048000e+03 : f32
    %182 = vector.broadcast %cst_104 : f32 to vector<1x1xf32>
    %183 = arith.divf %175, %182 : vector<1x1xf32>
    %cst_105 = arith.constant 2.048000e+03 : f32
    %184 = vector.broadcast %cst_105 : f32 to vector<1x1xf32>
    %185 = arith.divf %181, %184 : vector<1x1xf32>
    %186 = arith.mulf %183, %183 : vector<1x1xf32>
    %187 = arith.subf %185, %186 : vector<1x1xf32>
    %cst_106 = arith.constant 0.000000e+00 : f32
    %188 = vector.broadcast %cst_106 : f32 to vector<1x1xf32>
    %189 = arith.maximumf %187, %188 : vector<1x1xf32>
    %190 = vector.broadcast %183 : vector<1x1xf32> to vector<8x256xf32>
    %191 = arith.subf %168, %190 : vector<8x256xf32>
    %cst_107 = arith.constant 9.99999974E-6 : f32
    %192 = vector.broadcast %cst_107 : f32 to vector<1x1xf32>
    %193 = arith.addf %189, %192 : vector<1x1xf32>
    %194 = math.rsqrt %193 : vector<1x1xf32>
    %195 = vector.broadcast %194 : vector<1x1xf32> to vector<8x256xf32>
    %196 = arith.mulf %191, %195 : vector<8x256xf32>
    %197 = vector.broadcast %169 : vector<8x1xf32> to vector<8x256xf32>
    %198 = arith.mulf %196, %197 : vector<8x256xf32>
    %199 = vector.broadcast %170 : vector<8x1xf32> to vector<8x256xf32>
    %200 = arith.addf %198, %199 : vector<8x256xf32>
    %c0_108 = arith.constant 0 : index
    %c0_109 = arith.constant 0 : index
    %c0_110 = arith.constant 0 : index
    %201 = vector.load %arg8[%c0_108, %c0_109, %c0_110] : memref<1x8x256xf32, #tpu.memory_space<vmem>>, vector<1x8x256xf32>
    %202 = vector.shape_cast %201 : vector<1x8x256xf32> to vector<8x256xf32>
    %203 = vector.shape_cast %200 : vector<8x256xf32> to vector<1x8x256xf32>
    tpu.vector_store %arg8[%c0_108, %c0_109, %c0_110], %203 {strides = array<i32>} : memref<1x8x256xf32, #tpu.memory_space<vmem>>, vector<1x8x256xf32>,
    return
  }
  func.func @transform_0(%arg0: i32) -> (i32, i32, i32) {
    %c0_i32 = arith.constant 0 : i32
    %c0_i32_0 = arith.constant 0 : i32
    %c0_i32_1 = arith.constant 0 : i32
    return %arg0, %c0_i32, %c0_i32_0 : i32, i32, i32
  }
  func.func @transform_1(%arg0: i32) -> (i32, i32) {
    %c0_i32 = arith.constant 0 : i32
    %c0_i32_0 = arith.constant 0 : i32
    %c0_i32_1 = arith.constant 0 : i32
    return %c0_i32, %c0_i32_0 : i32, i32
  }
  func.func @transform_2(%arg0: i32) -> (i32, i32) {
    %c0_i32 = arith.constant 0 : i32
    %c0_i32_0 = arith.constant 0 : i32
    %c0_i32_1 = arith.constant 0 : i32
    return %c0_i32, %c0_i32_0 : i32, i32
  }
  func.func @transform_3(%arg0: i32) -> (i32, i32) {
    %c0_i32 = arith.constant 0 : i32
    %c0_i32_0 = arith.constant 0 : i32
    %c0_i32_1 = arith.constant 0 : i32
    return %c0_i32, %c0_i32_0 : i32, i32
  }
  func.func @transform_4(%arg0: i32) -> (i32, i32) {
    %c0_i32 = arith.constant 0 : i32
    %c0_i32_0 = arith.constant 0 : i32
    %c0_i32_1 = arith.constant 0 : i32
    return %c0_i32, %c0_i32_0 : i32, i32
  }
  func.func @transform_5(%arg0: i32) -> (i32, i32) {
    %c0_i32 = arith.constant 0 : i32
    %c0_i32_0 = arith.constant 0 : i32
    %c0_i32_1 = arith.constant 0 : i32
    return %c0_i32, %c0_i32_0 : i32, i32
  }
  func.func @transform_6(%arg0: i32) -> (i32, i32) {
    %c0_i32 = arith.constant 0 : i32
    %c0_i32_0 = arith.constant 0 : i32
    %c0_i32_1 = arith.constant 0 : i32
    return %c0_i32, %c0_i32_0 : i32, i32
  }
  func.func @transform_7(%arg0: i32) -> (i32, i32, i32) {
    %c0_i32 = arith.constant 0 : i32
    %c0_i32_0 = arith.constant 0 : i32
    %c0_i32_1 = arith.constant 0 : i32
    return %arg0, %c0_i32, %c0_i32_0 : i32, i32, i32
  }
}

</mosaic_0001>

<bundles_post_ra>
// kernel: tpu_custom_call.1
= control target key start
LH: loop header
LB: loop body
LE: loop exit
PB: predicated region body
PF: predicated region fallthrough
CT: control target
= control target key end

     0   :  { %12 = vsyncpa [#allocation5], 0  ;;  %s1755_s0 = inlined_call_operand.vmem [shape: f32[2,4,256], index: 0, kind: input, shape index: {}]   ;;  %s1756_s1 = inlined_call_operand.vmem [shape: f32[8,36], index: 1, kind: input, shape index: {}]   ;;  %s1757_s2 = inlined_call_operand.vmem [shape: f32[8,1], index: 2, kind: input, shape index: {}]   ;;  %s1758_s3 = inlined_call_operand.vmem [shape: f32[8,1], index: 3, kind: input, shape index: {}]   ;;  %s1759_s4 = inlined_call_operand.vmem [shape: f32[8,72], index: 4, kind: input, shape index: {}]   ;;  %s1760_s5 = inlined_call_operand.vmem [shape: f32[8,1], index: 5, kind: input, shape index: {}]   ;;  %s1761_s6 = inlined_call_operand.vmem [shape: f32[8,1], index: 6, kind: input, shape index: {}]   ;;  %s1762_s7 = inlined_call_operand.hbm [shape: f32[2,8,256], index: 7, kind: output, shape index: {}]  }
   0x1   :  { %14 = vsyncpa [#allocation5 + $0x1], 0  ;;  %s1415_s24 = smov 0   ;;  %s1417_s25 = smov 0  }
   0x2   :  { %s1419_s26 = smov 0   ;;  %s1421_s27 = smov 0  }
   0x3 LB: > { %s1436_s28 = sadd.s32 4294967295, %s1361_s27   ;;  %s1150_s29 = sadd.s32 4294967294, %s1361_s27   ;;  %s1361_s27 = sphi %s1421_s27, %s1768_s27   ;;  %s1357_s26 = sphi %s1419_s26, %s1767_s26   ;;  %s1353_s25 = sphi %s1417_s25, %s1766_s25   ;;  %s1349_s24 = sphi %s1415_s24, %s1765_s24  }
   0x4   : > { %s1440_s30 = sadd.s32 1, %s1361_s27   ;;  %s179_s8 = sadd.s32 1, %s1357_s26 }
   0x5   : > { %s176_s9 = ssub.s32 %s1361_s27, %s1440_s30  ;;  %p189_p0 = scmp.ne.s32.totalorder %s1357_s26, %s1353_s25 }
   0x6   : > { %p177_p1 = scmp.eq.s32.totalorder %s176_s9, 0  ;;  %p190_p2 = scmp.eq.s32.totalorder %s1436_s28, 1 }
   0x7   : > { %p195_p3 = scmp.ne.s32.totalorder %s1353_s25, %s1349_s24  ;;  %p196_p4 = scmp.eq.s32.totalorder %s1150_s29, 1 }
   0x8   : > { %s1451_s10 = scalar_select %p177_p1, %s1357_s26, %s179_s8  }
   0x9   : > { %p1453_p5 = por %p190_p2, %p189_p0  ;;  %p1457_p6 = por %p196_p4, %p195_p3 }
   0xa   : > { %p1153_p7 = scmp.ge.s32.totalorder %s1361_s27, 1  ;;  %p240_p8 = scmp.lt.s32.totalorder %s1361_s27, 3 }
   0xc   : > { %p241_p9 = pnand %p1153_p7, %p240_p8 }
   0xd   : > { %v281_v0 = vlaneseq (!%p241_p9)  ;;  %v1363_v1 = vmov (!%p241_p9), 0.0   ;;  %p272_p10 = scmp.lt.s32.totalorder (!%p241_p9), %s1436_s28, 1  ;;  %s1364_s18 = smov (!%p241_p9), 127   ;;  %vm374_vm4 = vcmask (!%p241_p9), 130048   ;;  %vm335_vm5 = vcmask (!%p241_p9), 908288  }
   0xe   : > { %244 = sbr.rel (%p241_p9) target bundleno = 1423 (0x58f), region = 48  ;;  %277 = vst [vmem:[#allocation2] sm:$0xff] (!%p241_p9), %v1363_v1  ;;  %278 = vst [vmem:[#allocation2 + $0x8] sm:$0xff] (!%p241_p9), %v1363_v1  ;;  %650 = vmatprep.mubr.f32.mxu0 (!%p241_p9), %v1363_v1  ;;  %1016 = vmatprep.mubr.f32.mxu1 (!%p241_p9), %v1363_v1  ;;  %s1365_s19 = smov (!%p241_p9), 113   ;;  %vm390_vm6 = vcmask (!%p241_p9), 924672   ;;  %vm528_vm7 = vcmask (!%p241_p9), 916480  }
   0xf   : > { %279 = vst [vmem:[#allocation2 + $0x10] sm:$0xff] (!%p241_p9), %v1363_v1  ;;  %280 = vst [vmem:[#allocation2 + $0x18] sm:$0xff] (!%p241_p9), %v1363_v1  ;;  %v282_v2 = vand.u32 (!%p241_p9), 127, %v281_v0  ;;  %s1366_s20 = smov (!%p241_p9), 111   ;;  %s1367_s21 = smov (!%p241_p9), 1   ;;  %vm407_vm8 = vcmask (!%p241_p9), 121856  }
  0x10   : > { %s1368_s22 = smov (!%p241_p9), 15   ;;  %s1369_s23 = smov (!%p241_p9), 17   ;;  %vm421_vm9 = vcmask (!%p241_p9), 1039360   ;;  %vm441_vm10 = vcmask (!%p241_p9), 7168   ;;  %vm352_vm11 = vcmask (!%p241_p9), 138240   ;;  %vm579_vm12 = vcmask (!%p241_p9), 1043456  }
  0x11   : > { %v283_v3 = vadd.s32 (!%p241_p9), 128, %v282_v2  ;;  %v288_v4 = vand.u32 (!%p241_p9), 15, %v282_v2  ;;  %s1370_s29 = smov (!%p241_p9), 16   ;;  %s1371_s8 = smov (!%p241_p9), 112   ;;  %vm575_vm13 = vcmask (!%p241_p9), 293888  }
  0x12   : > { %s1171_s16 = sshll.u32 (!%p241_p9), %s1436_s28, 8 }
  0x13   : > { %v295_v5 = vand.u32 (!%p241_p9), 15, %v283_v3  ;;  %vm308_vm0 = vcmp.ge.s32.totalorder (!%p241_p9), %v288_v4, 1  ;;  %vm314_vm1 = vcmp.le.s32.totalorder (!%p241_p9), %v288_v4, 14 }
  0x14   : > { %v1157_v6 = vsel (!%p241_p9), %vm308_vm0, 1.0, %v1363_v1  ;;  %v1159_v7 = vsel (!%p241_p9), %vm314_vm1, 1.0, %v1363_v1  ;;  %vm948_vm0 = vcmask (!%p241_p9), 588800  }
  0x15   : > { %s273_s13 = scalar_select %p272_p10, %s1436_s28, 1  ;;  %vm309_vm2 = vcmp.ge.s32.totalorder %v295_v5, 1  ;;  %vm315_vm3 = vcmp.le.s32.totalorder %v295_v5, 14  ;;  %v359_v14 = vld [vmem:[#allocation2] sm:$0xf] }
  0x16   : > { %v1158_v8 = vsel %vm309_vm2, 1.0, %v1363_v1  ;;  %v1160_v9 = vsel %vm315_vm3, 1.0, %v1363_v1  ;;  %v365_v16 = vrot.slane %v359_v14, 4  ;;  %v515_v22 = vld [vmem:[#allocation2 + $0x18] sm:$0xf] }
  0x17   : > { %s1170_s14 = sshll.u32 %s273_s13, 3  ;;  %v1254_v11 = vpack.i.bf16 %v1158_v8, %v1157_v6  ;;  %v1264_v12 = vpack.i.bf16 %v1160_v9, %v1159_v7  ;;  %v521_v23 = vrot.slane %v515_v22, 4  ;;  %v326_v27 = vld [vmem:[#allocation2] sm:$0xf]  ;;  %v486_v6 = vld [vmem:[#allocation2 + $0x18] sm:$0xf] }
  0x18   : > { %s276_s17 = scalar_lea.vmem %s1755_s0, %s1170_s14  ;;  %v381_v35 = vld [vmem:[#allocation2] sm:$0xf]  ;;  %s269_s14 = sand.u32 1, %s1353_s25  }
  0x19   : > { %v320_v10 = vld [vmem:[%s276_s17] sm:$0xff]  ;;  %1255 = vrot.lane.b32.xlu0 %v1254_v11, %s1364_s18  ;;  %1265 = vrot.lane.b32.xlu1 %v1264_v12, %s1365_s19  ;;  %s1154_s15 = sshll.u32 %s269_s14, 4  ;;  %s1077_s28 = scalar_lea.sflag [#allocation5], %s269_s14 }
  0x1a   : > { %324 = vst [vmem:[#allocation2 + $0x8] sm:$0xf] %v320_v10  ;;  %v322_v13 = vcombine.high %v320_v10, %v320_v10  ;;  %v414_v54 = vld [vmem:[#allocation2] sm:$0xf]  ;;  %s271_s17 = scalar_lea.vmem [#allocation4], %s1154_s15 }
  0x1c   : > { %325 = vst [vmem:[#allocation2 + $0x10] sm:$0xf] %v322_v13 }
  0x1d   : > { %1260 = vrot.lane.b32.xlu0 %v1254_v11, %s1366_s20  ;;  %1270 = vrot.lane.b32.xlu1 %v1264_v12, %s1367_s21 }
  0x21   : > { %v360_v15 = vld [vmem:[#allocation2 + $0x8] sm:$0xf]  ;;  %1275 = vrot.lane.b32.xlu0 %v1254_v11, %s1368_s22  ;;  %1280 = vrot.lane.b32.xlu1 %v1264_v12, %s1369_s23 }
  0x22   : > { %v366_v17 = vrot.slane %v360_v15, 4  ;;  %v452_v31 = vld [vmem:[#allocation2 + $0x8] sm:$0xf] }
  0x23   : > { %v361_v18 = vld [vmem:[#allocation2 + $0x10] sm:$0xf]  ;;  %v484_v36 = vld [vmem:[#allocation2 + $0x8] sm:$0xf] }
  0x24   : > { %v514_v19 = vld [vmem:[#allocation2 + $0x10] sm:$0xf]  ;;  %v367_v20 = vrot.slane %v361_v18, 4  ;;  %v327_v51 = vld [vmem:[#allocation2 + $0x8] sm:$0xf] }
  0x25   : > { %368 = vrot.lane.b32.xlu1 %v365_v16, %s1370_s29  ;;  %370 = vrot.lane.b32.xlu0 %v366_v17, %s1370_s29  ;;  %v520_v21 = vrot.slane %v514_v19, 4  ;;  %v328_v43 = vld [vmem:[#allocation2 + $0x10] sm:$0xf]  ;;  %v382_v63 = vld [vmem:[#allocation2 + $0x8] sm:$0xf] }
  0x26   : > { %v383_v53 = vld [vmem:[#allocation2 + $0x10] sm:$0xf]  ;;  %v415_v10 = vld [vmem:[#allocation2 + $0x8] sm:$0xf] }
  0x27   : > { %v485_v8 = vld [vmem:[#allocation2 + $0x10] sm:$0xf]  ;;  %v448_v14 = vld [vmem:[#allocation2 + $0x8] sm:$0xf] }
  0x28   : > { %v416_v12 = vld [vmem:[#allocation2 + $0x10] sm:$0xf]  ;;  %450 = vst [vmem:[#allocation3 + $0x20] sm:$0xf] %v448_v14 }
  0x29   : > { %372 = vrot.lane.b32.xlu1 %v367_v20, %s1370_s29  ;;  %524 = vrot.lane.b32.xlu0 %v520_v21, %s1371_s8  ;;  %v449_v13 = vld [vmem:[#allocation2 + $0x10] sm:$0xf]  ;;  %v454_v21 = vld [vmem:[#allocation2 + $0x18] sm:$0xf] }
  0x2a   : > { %451 = vst [vmem:[#allocation3 + $0x28] sm:$0xf] %v449_v13  ;;  %v453_v19 = vld [vmem:[#allocation2 + $0x10] sm:$0xf] }
  0x2d   : > { %526 = vrot.lane.b32.xlu1 %v521_v23, %s1371_s8 }
  0x8b   : > { %v1256_v24 = vpop.permute.xlu0 %1255  ;;  %v1266_v25 = vpop.permute.xlu1 %1265 }
  0x8c   : > { %v1493_v32 = vunpack.i.l.bf16 %v1266_v25  ;;  %v1509_v48 = vunpack.i.l.bf16 %v1256_v24  ;;  %v1511_v49 = vunpack.i.h.bf16 %v1266_v25  ;;  %v1527_v61 = vunpack.i.h.bf16 %v1256_v24 }
  0x8e   : > { %v395_v41 = vmul.f32 %v1493_v32, %v381_v35  ;;  %v397_v59 = vmul.f32 %v1511_v49, %v383_v53  ;;  %v426_v60 = vmul.f32 %v1509_v48, %v414_v54  ;;  %v1534_v0 = vsel %vm390_vm6, %v1493_v32, %v1511_v49 }
  0x8f   : > { %v1261_v26 = vpop.permute.xlu0 %1260  ;;  %v1271_v28 = vpop.permute.xlu1 %1270  ;;  %v396_v4 = vmul.f32 %v1534_v0, %v382_v63  ;;  %v1551_v11 = vsel %vm421_vm9, %v1509_v48, %v1527_v61  ;;  %v428_v18 = vmul.f32 %v1527_v61, %v416_v12 }
  0x90   : > { %v1489_v29 = vunpack.i.l.bf16 %v1261_v26  ;;  %v1491_v30 = vunpack.i.l.bf16 %v1271_v28  ;;  %v1502_v40 = vunpack.i.h.bf16 %v1261_v26  ;;  %v432_v5 = vrot.slane %v426_v60, 4 }
  0x91   : > { %v1541_v7 = vunpack.i.h.bf16 %v1271_v28  ;;  %v427_v17 = vmul.f32 %v1551_v11, %v415_v10  ;;  %v434_v25 = vrot.slane %v428_v18, 4  ;;  %v513_v28 = vld [vmem:[#allocation2 + $0x8] sm:$0xf] }
  0x92   : > { %v340_v33 = vmul.f32 %v1489_v29, %v326_v27  ;;  %v463_v39 = vmul.f32 %v1491_v30, %v452_v31  ;;  %v342_v50 = vmul.f32 %v1502_v40, %v328_v43  ;;  %v1517_v52 = vsel %vm335_vm5, %v1489_v29, %v1502_v40  ;;  %v536_v31 = vld [vmem:[#allocation2 + $0x10] sm:$0xf] }
  0x93   : > { %v1276_v34 = vpop.permute.xlu0 %1275  ;;  %v1496_v37 = vpop.permute.xlu1 %1280  ;;  %v341_v58 = vmul.f32 %v1517_v52, %v327_v51  ;;  %v1562_v20 = vsel %vm441_vm10, %v1491_v30, %v1541_v7  ;;  %v433_v24 = vrot.slane %v427_v17, 4  ;;  %v465_v27 = vmul.f32 %v1541_v7, %v454_v21 }
  0x94   : > { %v1498_v38 = vunpack.i.l.bf16 %v1276_v34  ;;  %346 = vrot.lane.b32.xlu0 %v340_v33, %s1369_s23  ;;  %v469_v46 = vrot.slane %v463_v39, 4  ;;  %v1529_v62 = vunpack.i.h.bf16 %v1276_v34  ;;  %v1567_v22 = vunpack.i.h.bf16 %v1496_v37  ;;  %v537_v39 = vld [vmem:[#allocation2 + $0x18] sm:$0xf] }
  0x95   : > { %v1570_v23 = vunpack.i.l.bf16 %v1496_v37  ;;  %v464_v26 = vmul.f32 %v1562_v20, %v453_v19  ;;  %v471_v35 = vrot.slane %v465_v27, 4 }
  0x96   : > { %v495_v42 = vmul.f32 %v1498_v38, %v484_v36  ;;  %v1546_v9 = vsel %vm407_vm8, %v1498_v38, %v1529_v62  ;;  %v497_v16 = vmul.f32 %v1529_v62, %v486_v6  ;;  %v519_v36 = vrot.slane %v513_v28, 4 }
  0x97   : > { %v369_v44 = vpop.permute.xlu1 %368  ;;  %v371_v45 = vpop.permute.xlu0 %370  ;;  %v496_v15 = vmul.f32 %v1546_v9, %v485_v8  ;;  %v1579_v33 = vsel %vm352_vm11, %v1570_v23, %v1567_v22  ;;  %v470_v34 = vrot.slane %v464_v26, 4 }
  0x98   : > { %401 = vrot.lane.b32.xlu0 %v395_v41, %s1368_s22  ;;  %501 = vrot.lane.b32.xlu1 %v495_v42, %s1365_s19  ;;  %v375_v47 = vsel %vm374_vm4, %v369_v44, %v371_v45  ;;  %v547_v37 = vmul.f32 %v1579_v33, %v536_v31  ;;  %v535_v41 = vld [vmem:[#allocation2 + $0x8] sm:$0xf]  ;;  %v548_v42 = vmul.f32 %v1567_v22, %v537_v39 }
  0x99   : > { %379 = vst [vmem:[#allocation3] sm:$0xf0] %v375_v47  ;;  %v546_v43 = vmul.f32 %v1570_v23, %v535_v41 }
  0x9b   : > { %v373_v55 = vpop.permute.xlu1 %372  ;;  %v1522_v57 = vpop.permute.xlu0 %524 }
  0x9c   : > { %472 = vrot.lane.b32.xlu0 %v469_v46, %s1364_s18  ;;  %350 = vrot.lane.b32.xlu1 %v342_v50, %s1369_s23  ;;  %v376_v56 = vsel %vm374_vm4, %v371_v45, %v373_v55 }
  0x9d   : > { %380 = vst [vmem:[#allocation3 + $0x8] sm:$0xf0] %v376_v56 }
  0x9f   : > { %v527_v2 = vpop.permute.xlu1 %526 }
  0xa0   : > { %348 = vrot.lane.b32.xlu0 %v341_v58, %s1369_s23  ;;  %405 = vrot.lane.b32.xlu1 %v397_v59, %s1368_s22  ;;  %v530_v3 = vsel %vm528_vm7, %v1522_v57, %v527_v2 }
  0xa1   : > { %534 = vst [vmem:[#allocation3 + $0x38] sm:$0xf0] %v530_v3 }
  0xa4   : > { %403 = vrot.lane.b32.xlu0 %v396_v4, %s1368_s22  ;;  %435 = vrot.lane.b32.xlu1 %v432_v5, %s1367_s21 }
  0xa8   : > { %503 = vrot.lane.b32.xlu0 %v496_v15, %s1365_s19  ;;  %505 = vrot.lane.b32.xlu1 %v497_v16, %s1365_s19 }
  0xac   : > { %437 = vrot.lane.b32.xlu0 %v433_v24, %s1367_s21  ;;  %439 = vrot.lane.b32.xlu1 %v434_v25, %s1367_s21 }
  0xb0   : > { %474 = vrot.lane.b32.xlu0 %v470_v34, %s1364_s18  ;;  %476 = vrot.lane.b32.xlu1 %v471_v35, %s1364_s18 }
  0xb4   : > { %522 = vrot.lane.b32.xlu0 %v519_v36, %s1371_s8  ;;  %554 = vrot.lane.b32.xlu1 %v547_v37, %s1366_s20 }
  0xb8   : > { %556 = vrot.lane.b32.xlu0 %v548_v42, %s1366_s20  ;;  %552 = vrot.lane.b32.xlu1 %v546_v43, %s1366_s20 }
 0x106   : > { %v347_v44 = vpop.permute.xlu0 %346 }
 0x10a   : > { %v402_v45 = vpop.permute.xlu0 %401  ;;  %v502_v46 = vpop.permute.xlu1 %501 }
 0x10e   : > { %v473_v47 = vpop.permute.xlu0 %472  ;;  %v351_v50 = vpop.permute.xlu1 %350 }
 0x112   : > { %v349_v51 = vpop.permute.xlu0 %348  ;;  %v406_v53 = vpop.permute.xlu1 %405 }
 0x113   : > { %v353_v54 = vsel %vm352_vm11, %v347_v44, %v349_v51  ;;  %v354_v55 = vsel %vm352_vm11, %v349_v51, %v351_v50  ;;  %v564_v44 = vld [vmem:[%s1756_s1] sm:$0xff] }
 0x114   : > { %357 = vst [vmem:[#allocation3] sm:$0xf] %v353_v54  ;;  %358 = vst [vmem:[#allocation3 + $0x8] sm:$0xf] %v354_v55 }
 0x116   : > { %v404_v56 = vpop.permute.xlu0 %403  ;;  %v436_v58 = vpop.permute.xlu1 %435 }
 0x117   : > { %v408_v59 = vsel %vm407_vm8, %v402_v45, %v404_v56  ;;  %v409_v60 = vsel %vm407_vm8, %v404_v56, %v406_v53  ;;  %v658_v56 = vld [vmem:[%s1758_s3] sm:$0xff] }
 0x118   : > { %412 = vst [vmem:[#allocation3 + $0x10] sm:$0xf] %v408_v59  ;;  %413 = vst [vmem:[#allocation3 + $0x18] sm:$0xf] %v409_v60  ;;  %v766_v59 = vmul.f32 0.0, %v1489_v29  ;;  %v805_v60 = vmul.f32 0.0, %v1493_v32 }
 0x119   : > { %v853_v29 = vmul.f32 0.0, %v1541_v7 }
 0x11a   : > { %v504_v63 = vpop.permute.xlu0 %503  ;;  %v506_v2 = vpop.permute.xlu1 %505 }
 0x11b   : > { %v507_v3 = vsel %vm390_vm6, %v502_v46, %v504_v63  ;;  %v508_v4 = vsel %vm390_vm6, %v504_v63, %v506_v2  ;;  %v566_v18 = vld [vmem:[#allocation3 + $0x8] sm:$0xff]  ;;  %v565_v24 = vld [vmem:[#allocation3] sm:$0xff]  ;;  %v1372_v46 = vmov 0   ;;  %v874_v63 = vmul.f32 0.0, %v1529_v62 }
 0x11c   : > { %511 = vst [vmem:[#allocation3 + $0x30] sm:$0xf] %v507_v3  ;;  %512 = vst [vmem:[#allocation3 + $0x38] sm:$0xf] %v508_v4  ;;  %1285 = vset.pattern.permute.xlu1 %v1372_v46  ;;  %1284 = vset.pattern.permute.xlu0 %v1372_v46  ;;  %v826_v2 = vmul.f32 0.0, %v1509_v48 }
 0x11e   : > { %v438_v5 = vpop.permute.xlu0 %437  ;;  %v440_v6 = vpop.permute.xlu1 %439 }
 0x11f   : > { %v442_v8 = vsel %vm441_vm10, %v436_v58, %v438_v5  ;;  %v443_v10 = vsel %vm441_vm10, %v438_v5, %v440_v6  ;;  %v657_v58 = vld [vmem:[%s1757_s2] sm:$0xff] }
 0x120   : > { %446 = vst [vmem:[#allocation3 + $0x10] sm:$0xf0] %v442_v8  ;;  %447 = vst [vmem:[#allocation3 + $0x18] sm:$0xf0] %v443_v10 }
 0x122   : > { %v475_v12 = vpop.permute.xlu0 %474  ;;  %v477_v13 = vpop.permute.xlu1 %476 }
 0x123   : > { %v478_v14 = vsel %vm421_vm9, %v473_v47, %v475_v12  ;;  %v479_v15 = vsel %vm421_vm9, %v475_v12, %v477_v13  ;;  %v572_v37 = vld [vmem:[#allocation3 + $0x38] sm:$0xff] }
 0x124   : > { %482 = vst [vmem:[#allocation3 + $0x20] sm:$0xf0] %v478_v14  ;;  %483 = vst [vmem:[#allocation3 + $0x28] sm:$0xf0] %v479_v15 }
 0x126   : > { %v523_v16 = vpop.permute.xlu0 %522  ;;  %v555_v17 = vpop.permute.xlu1 %554 }
 0x127   : > { %v529_v19 = vsel %vm528_vm7, %v523_v16, %v1522_v57  ;;  %v568_v21 = vld [vmem:[#allocation3 + $0x18] sm:$0xff]  ;;  %v567_v25 = vld [vmem:[#allocation3 + $0x10] sm:$0xff] }
 0x128   : > { %533 = vst [vmem:[#allocation3 + $0x30] sm:$0xf0] %v529_v19  ;;  %v1172_v26 = vpack.c.bf16 %v568_v21, %v566_v18  ;;  %v1174_v27 = vpack.c.bf16 %v567_v25, %v565_v24 }
 0x12a   : > { %v557_v28 = vpop.permute.xlu0 %556  ;;  %1173 = vmatprep.subr.bf16.mxu0 %v1172_v26  ;;  %v553_v31 = vpop.permute.xlu1 %552 }
 0x12b   : > { %v559_v34 = vsel %vm335_vm5, %v555_v17, %v557_v28  ;;  %v558_v35 = vsel %vm335_vm5, %v553_v31, %v555_v17  ;;  %1175 = vmatpush1.bf16.msra.mxu0 %v1174_v27  ;;  %v570_v36 = vld [vmem:[#allocation3 + $0x28] sm:$0xff]  ;;  %v569_v57 = vld [vmem:[#allocation3 + $0x20] sm:$0xff] }
 0x12c   : > { %563 = vst [vmem:[#allocation3 + $0x48] sm:$0xf] %v559_v34  ;;  %562 = vst [vmem:[#allocation3 + $0x40] sm:$0xf] %v558_v35  ;;  %v1176_v39 = vpack.c.bf16 %v572_v37, %v570_v36 }
 0x12e   : > { %1177 = vmatprep.subr.bf16.mxu0 %v1176_v39 }
 0x12f   : > { %v571_v41 = vld [vmem:[#allocation3 + $0x30] sm:$0xff] }
 0x130   : > { %v1178_v42 = vpack.c.bf16 %v571_v41, %v569_v57 }
 0x132   : > { %1179 = vmatpush1.bf16.msra.mxu0 %v1178_v42 }
 0x133   : > { %v574_v43 = vld [vmem:[#allocation3 + $0x48] sm:$0xf]  ;;  %v573_v45 = vld [vmem:[#allocation3 + $0x40] sm:$0xf] }
 0x134   : > { %1161 = vmatprep.subr.msk.mxu0 %vm579_vm12, %v574_v43 }
 0x136   : > { %1162 = vmatpush1.msk.msra.mxu0 %vm579_vm12, %v573_v45 }
 0x137   : > { %1163 = vmatmul.mubr.msk.f32.vlgmr.msra.gmra.mrb[0].mxu0 %vm575_vm13, %v564_v44 }
 0x20a   : > { %v652_v47 = vpop.f32.mrb[0].mxu0 }
 0x20b   : > { %v654_v50 = vpop.f32.mrb[1].mxu0  ;;  %v670_v51 = vmul.f32 %v652_v47, %v652_v47 }
 0x20c   : > { %v671_v53 = vmul.f32 %v654_v50, %v654_v50  ;;  %v659_v54 = vadd.f32 %v654_v50, %v652_v47 }
 0x20e   : > { %660 = vadd.xlane.f32.xlu0 %v659_v54  ;;  %v672_v55 = vadd.f32 %v671_v53, %v670_v51 }
 0x210   : > { %673 = vadd.xlane.f32.xlu1 %v672_v55 }
 0x221   : > { %704 = vperm.xlu1 %1285, %v658_v56  }
 0x224   : > { %697 = vperm.xlu0 %1284, %v657_v58  }
 0x225   : > { %772 = vrot.lane.b32.xlu1 %v766_v59, %s1369_s23 }
 0x228   : > { %811 = vrot.lane.b32.xlu0 %v805_v60, %s1368_s22 }
 0x229   : > { %790 = vrot.lane.b32.xlu1 %v1363_v1, %s1370_s29 }
 0x22c   : > { %882 = vrot.lane.b32.xlu0 %v874_v63, %s1365_s19 }
 0x22d   : > { %832 = vrot.lane.b32.xlu1 %v826_v2, %s1367_s21 }
 0x230   : > { %900 = vrot.lane.b32.xlu0 %v1363_v1, %s1371_s8 }
 0x231   : > { %861 = vrot.lane.b32.xlu1 %v853_v29, %s1364_s18 }
 0x29b   : > { %v661_v32 = vpop.xlane.xlu0 %660 }
 0x29c   : > { %v662_v3 = vrot.slane %v661_v32, 4 }
 0x29d   : > { %v674_v4 = vpop.xlane.xlu1 %673 }
 0x29e   : > { %v663_v5 = vadd.f32 %v662_v3, %v661_v32  ;;  %v675_v6 = vrot.slane %v674_v4, 4 }
 0x2a0   : > { %v664_v8 = vrot.slane %v663_v5, 2  ;;  %v676_v62 = vadd.f32 %v675_v6, %v674_v4 }
 0x2a1   : > { %v705_v39 = vpop.permute.xlu1 %704 }
 0x2a2   : > { %v677_v10 = vrot.slane %v676_v62, 2  ;;  %v665_v48 = vadd.f32 %v664_v8, %v663_v5 }
 0x2a3   : > { %v698_v35 = vpop.permute.xlu0 %697 }
 0x2a4   : > { %v666_v12 = vrot.slane %v665_v48, 1  ;;  %v678_v13 = vadd.f32 %v677_v10, %v676_v62 }
 0x2a6   : > { %v667_v14 = vadd.f32 %v666_v12, %v665_v48  ;;  %v679_v15 = vrot.slane %v678_v13, 1 }
 0x2a8   : > { %1196 = vpush %v667_v14  ;;  %v680_v7 = vadd.f32 %v679_v15, %v678_v13 }
 0x2aa   : > { %1198 = vpush %v680_v7 }
 0x2d9   : > { %s1197_s9 = spop %1196 }
 0x2da   : > { %v669_v1 = vstv %s1197_s9  ;;  %s1091_s9 = sshll.u32 %s271_s17, 4  ;;  %s1715_s9 = int_to_ptr.vmem [resolvable:$true] %s1091_s9 }
 0x2db   : > { %v684_v16 = vmul.f32 0.00048828125, %v669_v1  ;;  %s1199_s13 = spop %1198 }
 0x2dc   : > { %v682_v17 = vstv %s1199_s13 }
 0x2dd   : > { %v685_v18 = vmul.f32 0.00048828125, %v682_v17  ;;  %v686_v19 = vmul.f32 %v684_v16, %v684_v16  ;;  %v689_v26 = vsub.f32 %v652_v47, %v684_v16  ;;  %v690_v27 = vsub.f32 %v654_v50, %v684_v16 }
 0x2df   : > { %v687_v21 = vsub.f32 %v685_v18, %v686_v19 }
 0x2e1   : > { %v688_v24 = vmax.f32 %v687_v21, 0.0 }
 0x2e3   : > { %v691_v25 = vadd.f32 1e-05, %v688_v24 }
 0x2e5   : > { %1287 = vrsqrt.f32 %v691_v25  ;;  %v1373_v25 = vmov 1.0  }
 0x2ef   : > { %v1288_v28 = vpop.eup %1287 }
 0x2f0   : > { %v693_v31 = vmul.f32 %v1288_v28, %v689_v26  ;;  %v694_v34 = vmul.f32 %v1288_v28, %v690_v27 }
 0x2f2   : > { %v700_v36 = vmul.f32 %v698_v35, %v693_v31  ;;  %v701_v37 = vmul.f32 %v698_v35, %v694_v34 }
 0x2f4   : > { %v707_v57 = vadd.f32 %v705_v39, %v700_v36  ;;  %v708_v41 = vadd.f32 %v705_v39, %v701_v37 }
 0x2f6   : > { %v711_v42 = vmul.f32 0.70710677, %v707_v57  ;;  %v712_v43 = vmul.f32 0.70710677, %v708_v41  ;;  %v709_v35 = vmul.f32 0.5, %v707_v57  ;;  %v710_v37 = vmul.f32 0.5, %v708_v41 }
 0x2f8   : > { %v717_v44 = vand.u32 2147483647, %v711_v42  ;;  %v718_v45 = vand.u32 2147483647, %v712_v43  ;;  %vm713_vm14 = vcmp.lt.f32.partialorder %v711_v42, 0.0  ;;  %vm714_vm15 = vcmp.lt.f32.partialorder %v712_v43, 0.0 }
 0x2f9   : > { %v715_v26 = vsel %vm713_vm14, -1.0, %v1373_v25  ;;  %v716_v28 = vsel %vm714_vm15, -1.0, %v1373_v25 }
 0x2fa   : > { %v719_v46 = vmul.f32 0.3275911, %v717_v44  ;;  %v720_v51 = vmul.f32 0.3275911, %v718_v45  ;;  %v743_v47 = vsub.f32 0.0, %v717_v44  ;;  %v744_v50 = vsub.f32 0.0, %v718_v45 }
 0x2fc   : > { %v721_v53 = vadd.f32 1.0, %v719_v46  ;;  %v722_v54 = vadd.f32 1.0, %v720_v51  ;;  %v745_v56 = vmul.f32 %v743_v47, %v717_v44  ;;  %v746_v60 = vmul.f32 %v744_v50, %v718_v45 }
 0x2fe   : > { %1289 = vrcp.f32 %v721_v53  ;;  %v747_v32 = vmul.f32 1.442695, %v745_v56  ;;  %v749_v4 = vmul.f32 1.442695, %v746_v60 }
 0x2ff   : > { %1291 = vrcp.f32 %v722_v54 }
 0x300   : > { %1293 = vpow2.f32 %v747_v32 }
 0x301   : > { %1295 = vpow2.f32 %v749_v4 }
 0x308   : > { %v1290_v55 = vpop.eup %1289 }
 0x309   : > { %v1292_v58 = vpop.eup %1291  ;;  %v725_v59 = vmul.f32 1.0614054, %v1290_v55 }
 0x30a   : > { %v726_v63 = vmul.f32 1.0614054, %v1292_v58  ;;  %v1294_v16 = vpop.eup %1293 }
 0x30b   : > { %v727_v2 = vadd.f32 -1.4531521, %v725_v59  ;;  %v1296_v18 = vpop.eup %1295 }
 0x30c   : > { %v728_v29 = vadd.f32 -1.4531521, %v726_v63 }
 0x30d   : > { %v729_v3 = vmul.f32 %v1290_v55, %v727_v2 }
 0x30e   : > { %v730_v5 = vmul.f32 %v1292_v58, %v728_v29 }
 0x30f   : > { %v731_v6 = vadd.f32 1.4214138, %v729_v3 }
 0x310   : > { %v732_v8 = vadd.f32 1.4214138, %v730_v5 }
 0x311   : > { %v733_v62 = vmul.f32 %v1290_v55, %v731_v6 }
 0x312   : > { %v734_v10 = vmul.f32 %v1292_v58, %v732_v8 }
 0x313   : > { %v735_v48 = vadd.f32 -0.28449672, %v733_v62 }
 0x314   : > { %v736_v12 = vadd.f32 -0.28449672, %v734_v10 }
 0x315   : > { %v737_v13 = vmul.f32 %v1290_v55, %v735_v48 }
 0x316   : > { %v738_v14 = vmul.f32 %v1292_v58, %v736_v12 }
 0x317   : > { %v739_v15 = vadd.f32 0.2548296, %v737_v13 }
 0x318   : > { %v740_v7 = vadd.f32 0.2548296, %v738_v14 }
 0x319   : > { %v741_v1 = vmul.f32 %v1290_v55, %v739_v15 }
 0x31a   : > { %v742_v17 = vmul.f32 %v1292_v58, %v740_v7 }
 0x31b   : > { %v751_v19 = vmul.f32 %v1294_v16, %v741_v1 }
 0x31c   : > { %v752_v21 = vmul.f32 %v1296_v18, %v742_v17 }
 0x31d   : > { %v753_v24 = vsub.f32 1.0, %v751_v19 }
 0x31e   : > { %v754_v27 = vsub.f32 1.0, %v752_v21 }
 0x31f   : > { %v755_v31 = vmul.f32 %v753_v24, %v715_v26 }
 0x320   : > { %v756_v34 = vmul.f32 %v754_v27, %v716_v28 }
 0x321   : > { %v757_v36 = vadd.f32 1.0, %v755_v31 }
 0x322   : > { %v758_v39 = vadd.f32 1.0, %v756_v34 }
 0x323   : > { %v1627_v44 = vmul.f32 %v757_v36, %v709_v35 }
 0x324   : > { %v1629_v45 = vmul.f32 %v758_v39, %v710_v37  ;;  %v929_v37 = vld [vmem:[%s1759_s4] sm:$0xff] }
 0x325   : > { %761 = vst [vmem:[#allocation2 + $0x8] sm:$0xff] %v1627_v44  ;;  %792 = vrot.lane.b32.xlu1 %v1627_v44, %s1370_s29  ;;  %v806_v42 = vmul.f32 %v1627_v44, %v1534_v0  ;;  %846 = vst [vmem:[#allocation3 + $0x40] sm:$0xff] %v1627_v44  ;;  %v827_v57 = vmul.f32 %v1627_v44, %v1551_v11  ;;  %v767_v41 = vmul.f32 %v1627_v44, %v1517_v52 }
 0x326   : > { %762 = vst [vmem:[#allocation2 + $0x10] sm:$0xff] %v1629_v45  ;;  %847 = vst [vmem:[#allocation3 + $0x48] sm:$0xff] %v1629_v45  ;;  %v852_v0 = vmul.f32 %v1629_v45, %v1562_v20  ;;  %v851_v43 = vmul.f32 %v1491_v30, %v1627_v44  ;;  %v768_v11 = vmul.f32 %v1502_v40, %v1629_v45  ;;  %v913_v52 = vmul.f32 0.0, %v1567_v22  ;;  %v773_v22 = vpop.permute.xlu1 %772 }
 0x327   : > { %813 = vrot.lane.b32.xlu0 %v806_v42, %s1368_s22  ;;  %v807_v20 = vmul.f32 %v1511_v49, %v1629_v45  ;;  %v828_v30 = vmul.f32 %v1527_v61, %v1629_v45  ;;  %v873_v40 = vmul.f32 %v1629_v45, %v1546_v9  ;;  %v872_v46 = vmul.f32 %v1498_v38, %v1627_v44  ;;  %v812_v9 = vpop.permute.xlu0 %811 }
 0x328   : > { %v912_v49 = vmul.f32 %v1629_v45, %v1579_v33  ;;  %v911_v61 = vmul.f32 %v1570_v23, %v1627_v44 }
 0x329   : > { %794 = vrot.lane.b32.xlu1 %v1629_v45, %s1370_s29 }
 0x32a   : > { %v791_v51 = vpop.permute.xlu1 %790 }
 0x32b   : > { %834 = vrot.lane.b32.xlu0 %v827_v57, %s1367_s21  ;;  %v883_v54 = vpop.permute.xlu0 %882 }
 0x32d   : > { %898 = vrot.lane.b32.xlu1 %v1629_v45, %s1371_s8 }
 0x32e   : > { %v833_v53 = vpop.permute.xlu1 %832 }
 0x32f   : > { %859 = vrot.lane.b32.xlu0 %v852_v0, %s1364_s18  ;;  %v901_v50 = vpop.permute.xlu0 %900 }
 0x331   : > { %774 = vrot.lane.b32.xlu1 %v767_v41, %s1369_s23 }
 0x332   : > { %v862_v47 = vpop.permute.xlu1 %861 }
 0x333   : > { %857 = vrot.lane.b32.xlu0 %v851_v43, %s1364_s18  ;;  %v1024_v43 = vld [vmem:[%s1761_s6] sm:$0xff] }
 0x335   : > { %776 = vrot.lane.b32.xlu1 %v768_v11, %s1369_s23  ;;  %v1023_v11 = vld [vmem:[%s1760_s5] sm:$0xff] }
 0x337   : > { %896 = vrot.lane.b32.xlu0 %v1627_v44, %s1371_s8 }
 0x339   : > { %815 = vrot.lane.b32.xlu1 %v807_v20, %s1368_s22 }
 0x33b   : > { %921 = vrot.lane.b32.xlu0 %v913_v52, %s1366_s20 }
 0x33d   : > { %836 = vrot.lane.b32.xlu1 %v828_v30, %s1367_s21  ;;  %s1374_s21 = smov [#allocation4]  }
 0x33e   : > { %s1303_s22 = sshll.u32 %s1374_s21, 4  ;;  %s1304_s22 = int_to_ptr.vmem [resolvable:$false] %s1303_s22 }
 0x33f   : > { %s1305_s23 = scalar_lea.vmem %s1304_s22, 512  ;;  %p1306_p0 = scmp.lt.s32.totalorder %s1715_s9, %s1304_s22 }
 0x341   : > { %880 = vrot.lane.b32.xlu1 %v873_v40, %s1365_s19 }
 0x345   : > { %878 = vrot.lane.b32.xlu1 %v872_v46, %s1365_s19  ;;  %s1713_s19 = scalar_lea.hbm %s1762_s7, %s1171_s16 }
 0x349   : > { %919 = vrot.lane.b32.xlu1 %v912_v49, %s1366_s20 }
 0x34d   : > { %917 = vrot.lane.b32.xlu1 %v911_v61, %s1366_s20  ;;  %s1299_s20 = scalar_lea.vmem %s1715_s9, 256 }
 0x34e   : > { %p1300_p11 = scmp.ne.s32.totalorder %s1715_s9, %s1299_s20  ;;  %p1307_p1 = scmp.lt.s32.totalorder %s1305_s23, %s1299_s20 }
 0x350   : > { %p1301_p12 = pnand %p1300_p11, %p1453_p5  ;;  %p1308_p2 = por %p1307_p1, %p1306_p0 }
 0x352   : > { %p1302_p13 = pneg %p1301_p12 }
 0x354   : > { %p1309_p3 = pnand %p1308_p2, %p1302_p13 }
 0x397   : > { %v793_v38 = vpop.permute.xlu1 %792 }
 0x398   : > { %v796_v55 = vsel %vm374_vm4, %v791_v51, %v793_v38 }
 0x399   : > { %800 = vst [vmem:[#allocation3 + $0x10] sm:$0xff] %v796_v55  ;;  %v814_v56 = vpop.permute.xlu0 %813 }
 0x39a   : > { %v817_v33 = vsel %vm407_vm8, %v812_v9, %v814_v56 }
 0x39b   : > { %821 = vst [vmem:[#allocation3 + $0x20] sm:$0xff] %v817_v33  ;;  %v795_v58 = vpop.permute.xlu1 %794 }
 0x39c   : > { %v797_v23 = vsel %vm374_vm4, %v793_v38, %v795_v58 }
 0x39d   : > { %801 = vst [vmem:[#allocation3 + $0x18] sm:$0xff] %v797_v23  ;;  %v835_v59 = vpop.permute.xlu0 %834 }
 0x39e   : > { %v838_v60 = vsel %vm441_vm10, %v833_v53, %v835_v59 }
 0x39f   : > { %842 = vst [vmem:[#allocation3 + $0x30] sm:$0xff] %v838_v60  ;;  %v899_v63 = vpop.permute.xlu1 %898  ;;  %v1186_v17 = vpack.c.bf16 %v838_v60, %v817_v33 }
 0x3a0   : > { %v903_v2 = vsel %vm528_vm7, %v899_v63, %v901_v50 }
 0x3a1   : > { %v860_v29 = vpop.permute.xlu0 %859 }
 0x3a2   : > { %v864_v32 = vsel %vm421_vm9, %v860_v29, %v862_v47 }
 0x3a3   : > { %v775_v3 = vpop.permute.xlu1 %774  ;;  %v1188_v19 = vpack.c.bf16 %v864_v32, %v1629_v45 }
 0x3a4   : > { %v778_v4 = vsel %vm352_vm11, %v773_v22, %v775_v3 }
 0x3a5   : > { %782 = vst [vmem:[#allocation3] sm:$0xff] %v778_v4  ;;  %v858_v5 = vpop.permute.xlu0 %857  ;;  %v1182_v13 = vpack.c.bf16 %v796_v55, %v778_v4 }
 0x3a6   : > { %v863_v6 = vsel %vm421_vm9, %v858_v5, %v860_v29 }
 0x3a7   : > { %v777_v8 = vpop.permute.xlu1 %776  ;;  %v1190_v24 = vpack.c.bf16 %v863_v6, %v1627_v44 }
 0x3a8   : > { %v779_v62 = vsel %vm352_vm11, %v775_v3, %v777_v8 }
 0x3a9   : > { %783 = vst [vmem:[#allocation3 + $0x8] sm:$0xff] %v779_v62  ;;  %v897_v10 = vpop.permute.xlu0 %896  ;;  %v1180_v48 = vpack.c.bf16 %v797_v23, %v779_v62 }
 0x3aa   : > { %v902_v12 = vsel %vm528_vm7, %v897_v10, %v899_v63 }
 0x3ab   : > { %v816_v14 = vpop.permute.xlu1 %815  ;;  %1181 = vmatprep.subr.bf16.mxu1 %v1180_v48 }
 0x3ac   : > { %v818_v15 = vsel %vm407_vm8, %v814_v56, %v816_v14  ;;  %1183 = vmatpush1.bf16.msra.mxu1 %v1182_v13 }
 0x3ad   : > { %822 = vst [vmem:[#allocation3 + $0x28] sm:$0xff] %v818_v15  ;;  %v922_v31 = vpop.permute.xlu0 %921 }
 0x3af   : > { %v837_v7 = vpop.permute.xlu1 %836 }
 0x3b0   : > { %v839_v1 = vsel %vm441_vm10, %v835_v59, %v837_v7 }
 0x3b1   : > { %843 = vst [vmem:[#allocation3 + $0x38] sm:$0xff] %v839_v1  ;;  %v1184_v16 = vpack.c.bf16 %v839_v1, %v818_v15 }
 0x3b3   : > { %v881_v18 = vpop.permute.xlu1 %880  ;;  %1185 = vmatprep.subr.bf16.mxu1 %v1184_v16 }
 0x3b4   : > { %v885_v21 = vsel %vm390_vm6, %v881_v18, %v883_v54  ;;  %1187 = vmatpush1.bf16.msra.mxu1 %v1186_v17 }
 0x3b5   : > { %1189 = vmatprep.subr.bf16.mxu1 %v1188_v19  ;;  %v1192_v26 = vpack.c.bf16 %v903_v2, %v885_v21 }
 0x3b7   : > { %v879_v25 = vpop.permute.xlu1 %878 }
 0x3b8   : > { %v884_v27 = vsel %vm390_vm6, %v879_v25, %v881_v18  ;;  %1191 = vmatpush1.bf16.msra.mxu1 %v1190_v24 }
 0x3b9   : > { %1193 = vmatprep.subr.bf16.mxu1 %v1192_v26  ;;  %v1194_v28 = vpack.c.bf16 %v902_v12, %v884_v27 }
 0x3bb   : > { %v920_v34 = vpop.permute.xlu1 %919 }
 0x3bc   : > { %v924_v35 = vsel %vm335_vm5, %v920_v34, %v922_v31  ;;  %1195 = vmatpush1.bf16.msra.mxu1 %v1194_v28 }
 0x3bd   : > { %968 = vmatprep.subr.mxu1 %v924_v35 }
 0x3bf   : > { %v918_v36 = vpop.permute.xlu1 %917 }
 0x3c0   : > { %v923_v39 = vsel %vm335_vm5, %v918_v36, %v920_v34 }
 0x3c1   : > { %969 = vmatpush1.msra.mxu1 %v923_v39 }
 0x3c2   : > { %1164 = vmatmul.mubr.msk.f32.vlgmr.msra.gmra.mrb[0].mxu1 %vm948_vm0, %v929_v37 }
 0x495   : > { %v1018_v44 = vpop.f32.mrb[0].mxu1 }
 0x496   : > { %v1020_v45 = vpop.f32.mrb[1].mxu1  ;;  %v1036_v42 = vmul.f32 %v1018_v44, %v1018_v44 }
 0x497   : > { %v1037_v57 = vmul.f32 %v1020_v45, %v1020_v45  ;;  %v1025_v0 = vadd.f32 %v1020_v45, %v1018_v44 }
 0x499   : > { %1026 = vadd.xlane.f32.xlu0 %v1025_v0  ;;  %v1038_v41 = vadd.f32 %v1037_v57, %v1036_v42 }
 0x49b   : > { %1039 = vadd.xlane.f32.xlu1 %v1038_v41 }
 0x4ac   : > { %1069 = vperm.xlu1 %1285, %v1024_v43  }
 0x4af   : > { %1062 = vperm.xlu0 %1284, %v1023_v11  }
 0x526   : > { %v1027_v20 = vpop.xlane.xlu0 %1026 }
 0x527   : > { %v1028_v52 = vrot.slane %v1027_v20, 4 }
 0x528   : > { %v1040_v30 = vpop.xlane.xlu1 %1039 }
 0x529   : > { %v1029_v40 = vadd.f32 %v1028_v52, %v1027_v20  ;;  %v1041_v46 = vrot.slane %v1040_v30, 4 }
 0x52b   : > { %v1030_v49 = vrot.slane %v1029_v40, 2  ;;  %v1042_v61 = vadd.f32 %v1041_v46, %v1040_v30 }
 0x52c   : > { %v1070_v8 = vpop.permute.xlu1 %1069 }
 0x52d   : > { %v1043_v22 = vrot.slane %v1042_v61, 2  ;;  %v1031_v51 = vadd.f32 %v1030_v49, %v1029_v40 }
 0x52e   : > { %v1063_v4 = vpop.permute.xlu0 %1062 }
 0x52f   : > { %v1032_v9 = vrot.slane %v1031_v51, 1  ;;  %v1044_v53 = vadd.f32 %v1043_v22, %v1042_v61 }
 0x531   : > { %v1033_v54 = vadd.f32 %v1032_v9, %v1031_v51  ;;  %v1045_v47 = vrot.slane %v1044_v53, 1 }
 0x533   : > { %1200 = vpush %v1033_v54  ;;  %v1046_v50 = vadd.f32 %v1045_v47, %v1044_v53 }
 0x535   : > { %1202 = vpush %v1046_v50 }
 0x564   : > { %s1201_s29 = spop %1200 }
 0x565   : > { %v1035_v38 = vstv %s1201_s29 }
 0x566   : > { %v1049_v55 = vmul.f32 0.00048828125, %v1035_v38  ;;  %s1203_s8 = spop %1202 }
 0x567   : > { %v1048_v56 = vstv %s1203_s8 }
 0x568   : > { %v1050_v33 = vmul.f32 0.00048828125, %v1048_v56  ;;  %v1051_v58 = vmul.f32 %v1049_v55, %v1049_v55  ;;  %v1054_v63 = vsub.f32 %v1018_v44, %v1049_v55  ;;  %v1055_v2 = vsub.f32 %v1020_v45, %v1049_v55 }
 0x56a   : > { %v1052_v23 = vsub.f32 %v1050_v33, %v1051_v58 }
 0x56c   : > { %v1053_v59 = vmax.f32 %v1052_v23, 0.0 }
 0x56e   : > { %v1056_v60 = vadd.f32 1e-05, %v1053_v59 }
 0x570   : > { %1297 = vrsqrt.f32 %v1056_v60 }
 0x57a   : > { %v1298_v29 = vpop.eup %1297 }
 0x57b   : > { %v1058_v32 = vmul.f32 %v1298_v29, %v1054_v63  ;;  %v1059_v3 = vmul.f32 %v1298_v29, %v1055_v2 }
 0x57d   : > { %v1065_v5 = vmul.f32 %v1063_v4, %v1058_v32  ;;  %v1066_v6 = vmul.f32 %v1063_v4, %v1059_v3 }
 0x57f   : > { %v1072_v62 = vadd.f32 %v1070_v8, %v1065_v5  ;;  %v1073_v10 = vadd.f32 %v1070_v8, %v1066_v6 }
 0x581   : > { %1074 = vst [vmem:[%s271_s17] sm:$0xff] %v1072_v62  ;;  %1075 = vst [vmem:[%s271_s17 + $0x8] sm:$0xff] %v1073_v10 }
 0x582   : > { %1312 = shalt.err (!%p1309_p3)
}
 0x583   : > { %s1313_s29 = scalar_lea.hbm %s1713_s19, 256  ;;  %s1317_s15 = scalar_lea.hbm %s1762_s7, 512 }
 0x584   : > { %p1314_p4 = scmp.ne.s32.totalorder %s1713_s19, %s1313_s29  ;;  %p1318_p9 = scmp.lt.u32.totalorder %s1713_s19, %s1762_s7 }
 0x585   : > { %p1319_p10 = scmp.lt.u32.totalorder %s1317_s15, %s1313_s29  ;;  %p1321_p12 = scmp.lt.u32.totalorder %s1313_s29, %s1713_s19 }
 0x586   : > { %p1315_p7 = pnand %p1314_p4, %p1453_p5 }
 0x587   : > { %p1320_p11 = por %p1319_p10, %p1318_p9 }
 0x588   : > { %p1316_p8 = pneg %p1315_p7 }
 0x589   : > { %p1322_p13 = por %p1321_p12, %p1320_p11 }
 0x58b   : > { %p1323_p0 = pnand %p1322_p13, %p1316_p8 }
 0x58d   : > { %1326 = shalt.err (!%p1323_p0)
}
 0x58e   : > { %1204 = dma.vmem_to_hbm [thread:$0]  (%p1453_p5), %s1715_s9, 256, %s1713_s19, %s1077_s28  }
 0x58f PF: > { %p1210_p1 = scmp.ge.s32.totalorder %s1361_s27, 2  ;;  %s1103_s13 = sand.u32 1, %s1349_s24  }
 0x590   : > { %s1104_s18 = scalar_lea.sflag [#allocation5], %s1103_s13 }
 0x591   : > { %p1207_p2 = pnand %p1210_p1, %p1457_p6 }
 0x593   : > { %1344 = dma.done.wait (!%p1207_p2), %s1104_s18, 256  }
 0x594   : > { %1346 = vsyncadd (!%p1207_p2), %s1104_s18, 4294967040  ;;  %p17_p3 = scmp.ge.s32.totalorder %s1440_s30, 4   ;;  %s1765_s24 = smov %s1353_s25 }
 0x595   : > { %s1766_s25 = smov %s1357_s26  ;;  %s1767_s26 = smov %s1451_s10 }
 0x596   : > { %s1768_s27 = smov %s1440_s30  ;;  %19 = sbr.rel (!%p17_p3) target bundleno = 3 (0x3), region = 83 }
 0x59d   :  { %1109 = vsyncpa [#allocation5], 1 }
 0x59e   :  { %1111 = vsyncpa [#allocation5 + $0x1], 1 }

</bundles_post_ra>
